<compile_context>
chip_gen: v5e
topology: v5e:2x2
jax: 0.10.0
libtpu: 0.0.40
codegen_flags: <defaults>
</compile_context>

<pallas_src>
import functools

import jax
import jax.numpy as jnp
import numpy as np
from jax.experimental import pallas as pl
from jax.experimental.pallas import tpu as pltpu


# ----------------------------------------------------------------------------
# Fused kernel: 1x1 conv (C_in -> 512) + ReLU + avg-pool + classification head
# ----------------------------------------------------------------------------
def _fused_kernel(x_ref, wb_ref, bb_ref, w1t_ref, b1_ref, w2t_ref, b2_ref,
                  out_ref, acc_ref, *, hw, ts, compute_dtype):
    # x_ref:   (C_in, ts)   spatial tile of one batch element (lanes = spatial)
    # wb_ref:  (512, C_in)  conv weight (out_ch, in_ch)         [resident]
    # bb_ref:  (512, 1)     conv bias                           [resident]
    # w1t_ref: (256, 512)   Linear(512,256).weight (out, in)    [resident]
    # b1_ref:  (256, 1)
    # w2t_ref: (nc, 256)    Linear(256,nc).weight (out, in)     [resident]
    # b2_ref:  (nc, 1)
    # out_ref: (nc, 1)      per-batch output block              [resident]
    # acc_ref: (512, 128)   f32 lane-chunk spatial-sum accumulator (scratch)
    k = pl.program_id(1)
    nk = pl.num_programs(1)

    @pl.when(k == 0)
    def _init():
        acc_ref[...] = jnp.zeros_like(acc_ref)

    # (512, C) x (C, ts) MXU matmul; bias + ReLU on the VPU (bf16 on v6e/v7x).
    feats = jnp.dot(wb_ref[...], x_ref[...],
                    preferred_element_type=jnp.float32).astype(compute_dtype)
    feats = jnp.maximum(feats + bb_ref[...].astype(compute_dtype),
                        jnp.zeros((), compute_dtype))            # (512, ts)

    def _accumulate(f):
        # Lane-chunk accumulation: pure VPU adds on 128-lane aligned views.
        n_full = ts // 128
        rem = ts % 128
        if n_full:
            s = f[:, 0:128].astype(jnp.float32)
            for j in range(1, n_full):
                s = s + f[:, j * 128:(j + 1) * 128].astype(jnp.float32)
            acc_ref[...] += s
        if rem:  # only possible when ts == hw (full-extent block)
            acc_ref[:, :rem] += f[:, n_full * 128:].astype(jnp.float32)

    if hw % ts != 0:
        # Ragged last tile: mask only there (post-ReLU; relu(0 + b) != 0).
        @pl.when(k < nk - 1)
        def _interior():
            _accumulate(feats)

        @pl.when(k == nk - 1)
        def _last():
            sid = k * ts + jax.lax.broadcasted_iota(jnp.int32, (1, ts), 1)
            _accumulate(jnp.where(sid < hw, feats, jnp.zeros((), compute_dtype)))
    else:
        _accumulate(feats)

    @pl.when(k == nk - 1)
    def _finalize():
        # Single cross-lane reduce per batch element; sum -> mean.
        pooled = jnp.sum(acc_ref[...], axis=1, keepdims=True) * (1.0 / hw)  # (512,1) f32
        # Classification head fused here (pooled already resident in VMEM).
        h = jnp.dot(w1t_ref[...], pooled, preferred_element_type=jnp.float32)
        h = jnp.maximum(h + b1_ref[...], 0.0)                               # (256,1)
        # Dropout(0.5): identity in eval/inference mode.
        # TODO(synk): training-mode dropout (pltpu.prng_random_bits mask) not emitted.
        logits = jnp.dot(w2t_ref[...], h, preferred_element_type=jnp.float32)
        out_ref[...] = jax.nn.sigmoid(logits + b2_ref[...]).astype(out_ref.dtype)


def fused_forward(x3, wb, bb, w1t, b1, w2t, b2, *,
                  max_tile=4096, compute_dtype=jnp.float32):
    """x3: (B, C_in, H*W) NCHW-flattened input -> sigmoid probs (B, num_classes)."""
    B, c_in, hw = x3.shape
    c_out = wb.shape[0]
    nc = w2t.shape[0]
    # Spatial tile: full extent if it fits, otherwise a 128-aligned tile.
    ts = hw if hw <= max_tile else max_tile
    nk = pl.cdiv(hw, ts)

    kernel = functools.partial(_fused_kernel, hw=hw, ts=ts,
                               compute_dtype=compute_dtype)
    out = pl.pallas_call(
        kernel,
        out_shape=jax.ShapeDtypeStruct((B, nc, 1), jnp.float32),
        grid_spec=pltpu.PrefetchScalarGridSpec(
            num_scalar_prefetch=0,
            grid=(B, nk),
            in_specs=[
                pl.BlockSpec((None, c_in, ts), lambda b, k: (b, 0, k)),
                pl.BlockSpec((c_out, c_in), lambda b, k: (0, 0)),
                pl.BlockSpec((c_out, 1), lambda b, k: (0, 0)),
                pl.BlockSpec((w1t.shape[0], w1t.shape[1]), lambda b, k: (0, 0)),
                pl.BlockSpec((w1t.shape[0], 1), lambda b, k: (0, 0)),
                pl.BlockSpec((nc, w2t.shape[1]), lambda b, k: (0, 0)),
                pl.BlockSpec((nc, 1), lambda b, k: (0, 0)),
            ],
            out_specs=pl.BlockSpec((None, nc, 1), lambda b, k: (b, 0, 0)),
            scratch_shapes=[pltpu.VMEM((c_out, 128), jnp.float32)],
        ),
        compiler_params=pltpu.CompilerParams(
            dimension_semantics=("parallel", "arbitrary"),
            vmem_limit_bytes=32 * 1024 * 1024),   # safe on v5e/v6e/v7x for ts<=4096
    )(x3, wb, bb, w1t, b1, w2t, b2)
    return out.reshape(B, nc)


def autoencoder_model_forward(x_nchw, params, *,
                              compute_dtype=jnp.float32, max_tile=4096):
    B, C, H, W = x_nchw.shape
    x3 = x_nchw.reshape(B, C, H * W)   # free reshape of NCHW; no transpose pass
    return fused_forward(x3, params["wb"], params["bb"],
                         params["w1t"], params["b1"],
                         params["w2t"], params["b2"],
                         max_tile=max_tile, compute_dtype=compute_dtype)


def _default_compute_dtype():
    """bf16 elementwise chain on v6e/v7x (bf16 VPU); f32 elsewhere (e.g. v5e)."""
    try:
        kind = jax.devices()[0].device_kind.lower()
    except Exception:  # pragma: no cover
        return jnp.float32
    if "v6" in kind or "v7" in kind:
        return jnp.bfloat16
    return jnp.float32


def _reference_forward(x_nchw, params):
    B, C, H, W = x_nchw.shape
    x3 = x_nchw.reshape(B, C, H * W)
    feats = jnp.maximum(
        jnp.einsum("oc,bcs->bos", params["wb"], x3) + params["bb"][None], 0.0)
    pooled = jnp.mean(feats, axis=2)                                   # (B, 512)
    h = jnp.maximum(pooled @ params["w1t"].T + params["b1"][:, 0], 0.0)
    return jax.nn.sigmoid(h @ params["w2t"].T + params["b2"][:, 0])


if __name__ == "__main__":
    B, C, H, W = 2, 4, 16, 16
    NUM_CLASSES = 10

    key = jax.random.PRNGKey(0)
    kx, kwb, kbb, kw1, kb1, kw2, kb2 = jax.random.split(key, 7)

    x = jax.random.normal(kx, (B, C, H, W), dtype=jnp.float32)

    params = {
        # synthetic backbone: 1x1 conv C -> 512, weight layout (out_ch, in_ch)
        "wb": jax.random.normal(kwb, (512, C), dtype=jnp.float32) * 0.1,
        "bb": jax.random.normal(kbb, (512, 1), dtype=jnp.float32) * 0.05,
        # Linear(512, 256): PyTorch-native (out, in) layout
        "w1t": jax.random.normal(kw1, (256, 512), dtype=jnp.float32) * 0.05,
        "b1": jax.random.normal(kb1, (256, 1), dtype=jnp.float32) * 0.05,
        # Linear(256, num_classes): (out, in) layout
        "w2t": jax.random.normal(kw2, (NUM_CLASSES, 256), dtype=jnp.float32) * 0.05,
        "b2": jax.random.normal(kb2, (NUM_CLASSES, 1), dtype=jnp.float32) * 0.05,
    }

    compute_dtype = _default_compute_dtype()
    out = jax.block_until_ready(
        autoencoder_model_forward(x, params, compute_dtype=compute_dtype))
    ref = jax.block_until_ready(_reference_forward(x, params))

    assert out.shape == (B, NUM_CLASSES)
    if compute_dtype == jnp.bfloat16:
        rtol, atol = 2e-2, 2e-3   # bf16 elementwise chain (accumulation stays f32)
    else:
        rtol, atol = 1e-5, 1e-5
    np.testing.assert_allclose(np.asarray(out), np.asarray(ref), rtol=rtol, atol=atol)
    print("KERNEL_OK")
</pallas_src>

<mosaic_0001>
module attributes {stable_mosaic.version = 11 : i64} {
  func.func @_fused_kernel(%arg0: i32, %arg1: i32, %arg2: memref<1x4x256xf32, #tpu.memory_space<vmem>>, %arg3: memref<512x4xf32, #tpu.memory_space<vmem>>, %arg4: memref<512x1xf32, #tpu.memory_space<vmem>>, %arg5: memref<256x512xf32, #tpu.memory_space<vmem>>, %arg6: memref<256x1xf32, #tpu.memory_space<vmem>>, %arg7: memref<10x256xf32, #tpu.memory_space<vmem>>, %arg8: memref<10x1xf32, #tpu.memory_space<vmem>>, %arg9: memref<1x10x1xf32, #tpu.memory_space<vmem>>, %arg10: memref<512x128xf32, #tpu.memory_space<vmem>>) attributes {dimension_semantics = [#tpu.dimension_semantics<parallel>, #tpu.dimension_semantics<arbitrary>], iteration_bounds = array<i64: 2, 1>, scalar_prefetch = 0 : i64, scratch_operands = 1 : i64, tpu.core_type = #tpu.core_type<tc>, window_params = [{transform_indices = @transform_0, window_bounds = array<i64: 1, 4, 256>}, {pipeline_mode = #tpu.pipeline_mode<synchronous>, transform_indices = @transform_1, window_bounds = array<i64: 512, 4>}, {pipeline_mode = #tpu.pipeline_mode<synchronous>, transform_indices = @transform_2, window_bounds = array<i64: 512, 1>}, {pipeline_mode = #tpu.pipeline_mode<synchronous>, transform_indices = @transform_3, window_bounds = array<i64: 256, 512>}, {pipeline_mode = #tpu.pipeline_mode<synchronous>, transform_indices = @transform_4, window_bounds = array<i64: 256, 1>}, {pipeline_mode = #tpu.pipeline_mode<synchronous>, transform_indices = @transform_5, window_bounds = array<i64: 10, 256>}, {pipeline_mode = #tpu.pipeline_mode<synchronous>, transform_indices = @transform_6, window_bounds = array<i64: 10, 1>}, {transform_indices = @transform_7, window_bounds = array<i64: 1, 10, 1>}]} {
    %c0_i32 = arith.constant 0 : i32
    %0 = arith.cmpi eq, %arg1, %c0_i32 : i32
    %1 = arith.extui %0 : i1 to i32
    %c0_i32_0 = arith.constant 0 : i32
    %2 = arith.cmpi ne, %1, %c0_i32_0 : i32
    scf.if %2 {
      %cst_14 = arith.constant 0.000000e+00 : f32
      %21 = vector.broadcast %cst_14 : f32 to vector<512x128xf32>
      %c0_15 = arith.constant 0 : index
      %c0_16 = arith.constant 0 : index
      %22 = vector.load %arg10[%c0_15, %c0_16] : memref<512x128xf32, #tpu.memory_space<vmem>>, vector<512x128xf32>
      tpu.vector_store %arg10[%c0_15, %c0_16], %21 {strides = array<i32>} : memref<512x128xf32, #tpu.memory_space<vmem>>, vector<512x128xf32>,
    } else {
    }
    %c0 = arith.constant 0 : index
    %c0_1 = arith.constant 0 : index
    %3 = vector.load %arg3[%c0, %c0_1] : memref<512x4xf32, #tpu.memory_space<vmem>>, vector<512x4xf32>
    %c0_2 = arith.constant 0 : index
    %c0_3 = arith.constant 0 : index
    %c0_4 = arith.constant 0 : index
    %4 = vector.load %arg2[%c0_2, %c0_3, %c0_4] : memref<1x4x256xf32, #tpu.memory_space<vmem>>, vector<1x4x256xf32>
    %5 = vector.shape_cast %4 : vector<1x4x256xf32> to vector<4x256xf32>
    %cst = arith.constant dense<0.000000e+00> : vector<512x256xf32>
    %6 = tpu.matmul %3, %5, %cst {dimension_numbers = #tpu.dot_dimension_numbers<[1], [0], [0], [1], [0, 0, 1, 1], [], []>} : vector<512x4xf32>, vector<4x256xf32>, vector<512x256xf32> -> vector<512x256xf32>
    %c0_5 = arith.constant 0 : index
    %c0_6 = arith.constant 0 : index
    %7 = vector.load %arg4[%c0_5, %c0_6] : memref<512x1xf32, #tpu.memory_space<vmem>>, vector<512x1xf32>
    %8 = vector.broadcast %7 : vector<512x1xf32> to vector<512x256xf32>
    %9 = arith.addf %6, %8 : vector<512x256xf32>
    %cst_7 = arith.constant 0.000000e+00 : f32
    %10 = vector.broadcast %cst_7 : f32 to vector<512x256xf32>
    %11 = arith.maximumf %9, %10 : vector<512x256xf32>
    %12 = vector.extract_strided_slice %11 {offsets = [0, 0], sizes = [512, 128], strides = [1, 1]} : vector<512x256xf32> to vector<512x128xf32>
    %13 = vector.extract_strided_slice %11 {offsets = [0, 128], sizes = [512, 128], strides = [1, 1]} : vector<512x256xf32> to vector<512x128xf32>
    %14 = arith.addf %12, %13 : vector<512x128xf32>
    %c0_8 = arith.constant 0 : index
    %c0_9 = arith.constant 0 : index
    %15 = vector.load %arg10[%c0_8, %c0_9] : memref<512x128xf32, #tpu.memory_space<vmem>>, vector<512x128xf32>
    %16 = arith.addf %15, %14 : vector<512x128xf32>
    %c0_10 = arith.constant 0 : index
    %c0_11 = arith.constant 0 : index
    %17 = vector.load %arg10[%c0_10, %c0_11] : memref<512x128xf32, #tpu.memory_space<vmem>>, vector<512x128xf32>
    tpu.vector_store %arg10[%c0_10, %c0_11], %16 {strides = array<i32>} : memref<512x128xf32, #tpu.memory_space<vmem>>, vector<512x128xf32>,
    %c0_i32_12 = arith.constant 0 : i32
    %18 = arith.cmpi eq, %arg1, %c0_i32_12 : i32
    %19 = arith.extui %18 : i1 to i32
    %c0_i32_13 = arith.constant 0 : i32
    %20 = arith.cmpi ne, %19, %c0_i32_13 : i32
    scf.if %20 {
      %c0_14 = arith.constant 0 : index
      %c0_15 = arith.constant 0 : index
      %21 = vector.load %arg10[%c0_14, %c0_15] : memref<512x128xf32, #tpu.memory_space<vmem>>, vector<512x128xf32>
      %cst_16 = arith.constant dense<0.000000e+00> : vector<512xf32>
      %22 = vector.multi_reduction <add>, %21, %cst_16 [1] : vector<512x128xf32> to vector<512xf32>
      %23 = vector.shape_cast %22 : vector<512xf32> to vector<512x1xf32>
      %cst_17 = arith.constant 3.906250e-03 : f32
      %24 = vector.broadcast %cst_17 : f32 to vector<512x1xf32>
      %25 = arith.mulf %23, %24 : vector<512x1xf32>
      %c0_18 = arith.constant 0 : index
      %c0_19 = arith.constant 0 : index
      %26 = vector.load %arg5[%c0_18, %c0_19] : memref<256x512xf32, #tpu.memory_space<vmem>>, vector<256x512xf32>
      %cst_20 = arith.constant dense<0.000000e+00> : vector<256x1xf32>
      %27 = tpu.matmul %26, %25, %cst_20 {dimension_numbers = #tpu.dot_dimension_numbers<[1], [0], [0], [1], [0, 0, 1, 1], [], []>} : vector<256x512xf32>, vector<512x1xf32>, vector<256x1xf32> -> vector<256x1xf32>
      %c0_21 = arith.constant 0 : index
      %c0_22 = arith.constant 0 : index
      %28 = vector.load %arg6[%c0_21, %c0_22] : memref<256x1xf32, #tpu.memory_space<vmem>>, vector<256x1xf32>
      %29 = arith.addf %27, %28 : vector<256x1xf32>
      %cst_23 = arith.constant 0.000000e+00 : f32
      %30 = vector.broadcast %cst_23 : f32 to vector<256x1xf32>
      %31 = arith.maximumf %29, %30 : vector<256x1xf32>
      %c0_24 = arith.constant 0 : index
      %c0_25 = arith.constant 0 : index
      %32 = vector.load %arg7[%c0_24, %c0_25] : memref<10x256xf32, #tpu.memory_space<vmem>>, vector<10x256xf32>
      %cst_26 = arith.constant dense<0.000000e+00> : vector<10x1xf32>
      %33 = tpu.matmul %32, %31, %cst_26 {dimension_numbers = #tpu.dot_dimension_numbers<[1], [0], [0], [1], [0, 0, 1, 1], [], []>} : vector<10x256xf32>, vector<256x1xf32>, vector<10x1xf32> -> vector<10x1xf32>
      %c0_27 = arith.constant 0 : index
      %c0_28 = arith.constant 0 : index
      %34 = vector.load %arg8[%c0_27, %c0_28] : memref<10x1xf32, #tpu.memory_space<vmem>>, vector<10x1xf32>
      %35 = arith.addf %33, %34 : vector<10x1xf32>
      %36 = arith.negf %35 : vector<10x1xf32>
      %37 = math.exp %36 : vector<10x1xf32>
      %cst_29 = arith.constant 1.000000e+00 : f32
      %38 = vector.broadcast %cst_29 : f32 to vector<10x1xf32>
      %39 = arith.addf %38, %37 : vector<10x1xf32>
      %40 = arith.divf %38, %39 : vector<10x1xf32>
      %c0_30 = arith.constant 0 : index
      %c0_31 = arith.constant 0 : index
      %c0_32 = arith.constant 0 : index
      %41 = vector.load %arg9[%c0_30, %c0_31, %c0_32] : memref<1x10x1xf32, #tpu.memory_space<vmem>>, vector<1x10x1xf32>
      %42 = vector.shape_cast %41 : vector<1x10x1xf32> to vector<10x1xf32>
      %43 = vector.shape_cast %40 : vector<10x1xf32> to vector<1x10x1xf32>
      tpu.vector_store %arg9[%c0_30, %c0_31, %c0_32], %43 {strides = array<i32>} : memref<1x10x1xf32, #tpu.memory_space<vmem>>, vector<1x10x1xf32>,
    } else {
    }
    return
  }
  func.func @transform_0(%arg0: i32, %arg1: i32) -> (i32, i32, i32) {
    %c0_i32 = arith.constant 0 : i32
    %c0_i32_0 = arith.constant 0 : i32
    return %arg0, %c0_i32, %arg1 : i32, i32, i32
  }
  func.func @transform_1(%arg0: i32, %arg1: i32) -> (i32, i32) {
    %c0_i32 = arith.constant 0 : i32
    %c0_i32_0 = arith.constant 0 : i32
    %c0_i32_1 = arith.constant 0 : i32
    return %c0_i32, %c0_i32_0 : i32, i32
  }
  func.func @transform_2(%arg0: i32, %arg1: i32) -> (i32, i32) {
    %c0_i32 = arith.constant 0 : i32
    %c0_i32_0 = arith.constant 0 : i32
    %c0_i32_1 = arith.constant 0 : i32
    return %c0_i32, %c0_i32_0 : i32, i32
  }
  func.func @transform_3(%arg0: i32, %arg1: i32) -> (i32, i32) {
    %c0_i32 = arith.constant 0 : i32
    %c0_i32_0 = arith.constant 0 : i32
    %c0_i32_1 = arith.constant 0 : i32
    return %c0_i32, %c0_i32_0 : i32, i32
  }
  func.func @transform_4(%arg0: i32, %arg1: i32) -> (i32, i32) {
    %c0_i32 = arith.constant 0 : i32
    %c0_i32_0 = arith.constant 0 : i32
    %c0_i32_1 = arith.constant 0 : i32
    return %c0_i32, %c0_i32_0 : i32, i32
  }
  func.func @transform_5(%arg0: i32, %arg1: i32) -> (i32, i32) {
    %c0_i32 = arith.constant 0 : i32
    %c0_i32_0 = arith.constant 0 : i32
    %c0_i32_1 = arith.constant 0 : i32
    return %c0_i32, %c0_i32_0 : i32, i32
  }
  func.func @transform_6(%arg0: i32, %arg1: i32) -> (i32, i32) {
    %c0_i32 = arith.constant 0 : i32
    %c0_i32_0 = arith.constant 0 : i32
    %c0_i32_1 = arith.constant 0 : i32
    return %c0_i32, %c0_i32_0 : i32, i32
  }
  func.func @transform_7(%arg0: i32, %arg1: i32) -> (i32, i32, i32) {
    %c0_i32 = arith.constant 0 : i32
    %c0_i32_0 = arith.constant 0 : i32
    %c0_i32_1 = arith.constant 0 : i32
    return %arg0, %c0_i32, %c0_i32_0 : i32, i32, i32
  }
}

</mosaic_0001>

<bundles_post_ra>
// kernel: tpu_custom_call.1
= control target key start
LH: loop header
LB: loop body
LE: loop exit
PB: predicated region body
PF: predicated region fallthrough
CT: control target
= control target key end

     0   :  { %s3140_s24 = smov 0   ;;  %s3142_s25 = smov 0   ;;  %s4853_s0 = inlined_call_operand.vmem [shape: f32[2,4,256], index: 0, kind: input, shape index: {}]   ;;  %s4854_s1 = inlined_call_operand.vmem [shape: f32[512,4], index: 1, kind: input, shape index: {}]   ;;  %s4855_s2 = inlined_call_operand.vmem [shape: f32[512,1], index: 2, kind: input, shape index: {}]   ;;  %s4856_s3 = inlined_call_operand.vmem [shape: f32[256,512], index: 3, kind: input, shape index: {}]   ;;  %s4857_s4 = inlined_call_operand.vmem [shape: f32[256,1], index: 4, kind: input, shape index: {}]   ;;  %s4858_s5 = inlined_call_operand.vmem [shape: f32[10,256], index: 5, kind: input, shape index: {}]   ;;  %s4859_s6 = inlined_call_operand.vmem [shape: f32[10,1], index: 6, kind: input, shape index: {}]   ;;  %s4860_s7 = inlined_call_operand.vmem [shape: f32[2,10,1], index: 7, kind: output, shape index: {}]  }
   0x1   :  { %s3144_s26 = smov 0  }
   0x2 LB: > { %s29_s27 = sadd.s32 1, %s3093_s25  ;;  %p2898_p0 = scmp.ge.s32.totalorder %s3097_s26, 1  ;;  %s3097_s26 = sphi %s3144_s26, %s17_s26   ;;  %s3093_s25 = sphi %s3142_s25, %s4908_s25   ;;  %s3089_s24 = sphi %s3140_s24, %s4907_s24  }
   0x3   : > { %p31_p1 = scmp.ge.s32.totalorder %s29_s27, 2  ;;  %p256_p2 = scmp.lt.s32.totalorder %s3097_s26, 3 }
   0x5   : > { %s4910_s27 = smov (%p31_p1, %s29_s27), 0  ;;  %p257_p3 = pnand %p2898_p0, %p256_p2 }
   0x7   : > { %260 = sbr.rel (%p257_p3) target bundleno = 1414 (0x586), region = 48 }
   0xc   : > { %v471_v0 = vld [vmem:[%s4855_s2 + $0xf8] sm:$0xff]  ;;  %v470_v1 = vld [vmem:[%s4855_s2 + $0xf0] sm:$0xff]  ;;  %p293_p4 = scmp.lt.s32.totalorder %s3089_s24, 1  ;;  %v3099_v3 = vmov 0   ;;  %v453_v5 = vld [vmem:[%s4855_s2 + $0x68] sm:$0xff]  ;;  %vm1021_vm0 = vcmask 1043456  }
   0xd   : > { %v455_v2 = vld [vmem:[%s4855_s2 + $0x78] sm:$0xff]  ;;  %3066 = vset.pattern.permute.xlu2 %v3099_v3  ;;  %3065 = vset.pattern.permute.xlu1 %v3099_v3  ;;  %v454_v6 = vld [vmem:[%s4855_s2 + $0x70] sm:$0xff]  ;;  %v452_v7 = vld [vmem:[%s4855_s2 + $0x60] sm:$0xff]  ;;  %vm828_vm1 = vcmask 31744   ;;  %vm2821_vm5 = vcmask 7168   ;;  %vm2823_vm10 = vcmask 1024  }
   0xe   : > { %3064 = vset.pattern.permute.xlu0 %v3099_v3  ;;  %661 = vperm.xlu1 %3065, %v471_v0   ;;  %s4912_s24 = smov (!%p293_p4, %s3089_s24), 1  ;;  %v375_v8 = vld [vmem:[%s4854_s1] sm:$0xff]  ;;  %v451_v11 = vld [vmem:[%s4855_s2 + $0x58] sm:$0xff]  ;;  %v469_v12 = vld [vmem:[%s4855_s2 + $0xe8] sm:$0xff] }
   0xf   : > { %656 = vperm.xlu2 %3066, %v470_v1   ;;  %581 = vperm.xlu0 %3064, %v455_v2   ;;  %s3037_s11 = sshll.u32 %s4912_s24, 3  ;;  %v468_v13 = vld [vmem:[%s4855_s2 + $0xe0] sm:$0xff]  ;;  %v376_v14 = vld [vmem:[%s4854_s1 + $0x8] sm:$0xff]  ;;  %v467_v15 = vld [vmem:[%s4855_s2 + $0xd8] sm:$0xff]  ;;  %s3038_s8 = sshll.u32 %s4912_s24, 4 }
  0x10   : > { %s300_s14 = scalar_lea.vmem %s4853_s0, %s3037_s11  ;;  %v450_v16 = vld [vmem:[%s4855_s2 + $0x50] sm:$0xff]  ;;  %v449_v17 = vld [vmem:[%s4855_s2 + $0x48] sm:$0xff]  ;;  %v448_v19 = vld [vmem:[%s4855_s2 + $0x40] sm:$0xff]  ;;  %s306_s11 = scalar_lea.vmem %s4860_s7, %s3038_s8 }
  0x11   : > { %v439_v4 = vld [vmem:[%s300_s14] sm:$0xff]  ;;  %v377_v18 = vld [vmem:[%s4854_s1 + $0x10] sm:$0xff]  ;;  %v465_v21 = vld [vmem:[%s4855_s2 + $0xc8] sm:$0xff] }
  0x12   : > { %825 = vst [vmem:[#allocation1] ss:$2 sm:$0xff] %v439_v4  ;;  %v466_v20 = vld [vmem:[%s4855_s2 + $0xd0] sm:$0xff]  ;;  %v378_v22 = vld [vmem:[%s4854_s1 + $0x18] sm:$0xff]  ;;  %v464_v23 = vld [vmem:[%s4855_s2 + $0xc0] sm:$0xff] }
  0x13   : > { %v447_v24 = vld [vmem:[%s4855_s2 + $0x38] sm:$0xff]  ;;  %v446_v25 = vld [vmem:[%s4855_s2 + $0x30] sm:$0xff]  ;;  %v379_v26 = vld [vmem:[%s4854_s1 + $0x20] sm:$0xff] }
  0x14   : > { %v445_v27 = vld [vmem:[%s4855_s2 + $0x28] sm:$0xff]  ;;  %v463_v28 = vld [vmem:[%s4855_s2 + $0xb8] sm:$0xff]  ;;  %v462_v29 = vld [vmem:[%s4855_s2 + $0xb0] sm:$0xff] }
  0x15   : > { %v380_v30 = vld [vmem:[%s4854_s1 + $0x28] sm:$0xff]  ;;  %v444_v32 = vld [vmem:[%s4855_s2 + $0x20] sm:$0xff]  ;;  %v443_v33 = vld [vmem:[%s4855_s2 + $0x18] sm:$0xff] }
  0x16   : > { %571 = vperm.xlu1 %3065, %v453_v5   ;;  %v461_v31 = vld [vmem:[%s4855_s2 + $0xa8] sm:$0xff]  ;;  %v381_v34 = vld [vmem:[%s4854_s1 + $0x30] sm:$0xff]  ;;  %v460_v36 = vld [vmem:[%s4855_s2 + $0xa0] sm:$0xff] }
  0x17   : > { %576 = vperm.xlu0 %3064, %v454_v6   ;;  %566 = vperm.xlu2 %3066, %v452_v7   ;;  %v442_v35 = vld [vmem:[%s4855_s2 + $0x10] sm:$0xff]  ;;  %v459_v37 = vld [vmem:[%s4855_s2 + $0x98] sm:$0xff]  ;;  %v441_v39 = vld [vmem:[%s4855_s2 + $0x8] sm:$0xff] }
  0x18   : > { %v382_v38 = vld [vmem:[%s4854_s1 + $0x38] sm:$0xff]  ;;  %v440_v40 = vld [vmem:[%s4855_s2] sm:$0xff]  ;;  %v384_v42 = vld [vmem:[%s4854_s1 + $0x48] sm:$0xff] }
  0x19   : > { %v826_v9 = vld.sshfl [vmem:[#allocation1] sm:$0xff pattern:$0x75316420]  ;;  %v827_v10 = vld.sshfl [vmem:[#allocation1 + $0x8] sm:$0xff pattern:$0x75316420] }
  0x1a   : > { %2903 = vmatpush.msk.msra.mxu0 %vm1021_vm0, %v826_v9  ;;  %2968 = vmatpush.msk.msra.mxu1 %vm1021_vm0, %v827_v10  ;;  %v383_v41 = vld [vmem:[%s4854_s1 + $0x40] sm:$0xff]  ;;  %v385_v44 = vld [vmem:[%s4854_s1 + $0x50] sm:$0xff]  ;;  %v386_v46 = vld [vmem:[%s4854_s1 + $0x58] sm:$0xff] }
  0x1b   : > { %2904 = vmatmul.msk.f32.vlgmr.msra.gmra.mxu0 %vm828_vm1, %v375_v8  ;;  %2969 = vmatmul.msk.f32.vlgmr.msra.gmra.mxu1 %vm828_vm1, %v375_v8  ;;  %v387_v48 = vld [vmem:[%s4854_s1 + $0x60] sm:$0xff]  ;;  %v458_v49 = vld [vmem:[%s4855_s2 + $0x90] sm:$0xff]  ;;  %v388_v53 = vld [vmem:[%s4854_s1 + $0x68] sm:$0xff] }
  0x1c   : > { %v457_v54 = vld [vmem:[%s4855_s2 + $0x88] sm:$0xff]  ;;  %v456_v55 = vld [vmem:[%s4855_s2 + $0x80] sm:$0xff]  ;;  %v389_v59 = vld [vmem:[%s4854_s1 + $0x70] sm:$0xff] }
  0x1d   : > { %v390_v63 = vld [vmem:[%s4854_s1 + $0x78] sm:$0xff]  ;;  %v391_v3 = vld [vmem:[%s4854_s1 + $0x80] sm:$0xff]  ;;  %v392_v9 = vld [vmem:[%s4854_s1 + $0x88] sm:$0xff] }
  0x1e   : > { %561 = vperm.xlu1 %3065, %v451_v11  }
  0x1f   : > { %651 = vperm.xlu0 %3064, %v469_v12   ;;  %646 = vperm.xlu2 %3066, %v468_v13  }
  0x23   : > { %2905 = vmatmul.msk.f32.gmra.mxu0 %vm828_vm1, %v376_v14  ;;  %2970 = vmatmul.msk.f32.gmra.mxu1 %vm828_vm1, %v376_v14 }
  0x26   : > { %641 = vperm.xlu1 %3065, %v467_v15   ;;  %v393_v15 = vld [vmem:[%s4854_s1 + $0x90] sm:$0xff] }
  0x27   : > { %556 = vperm.xlu0 %3064, %v450_v16   ;;  %551 = vperm.xlu2 %3066, %v449_v17  }
  0x2b   : > { %2906 = vmatmul.msk.f32.gmra.mxu0 %vm828_vm1, %v377_v18  ;;  %2971 = vmatmul.msk.f32.gmra.mxu1 %vm828_vm1, %v377_v18 }
  0x2e   : > { %546 = vperm.xlu1 %3065, %v448_v19  }
  0x2f   : > { %636 = vperm.xlu0 %3064, %v466_v20   ;;  %631 = vperm.xlu2 %3066, %v465_v21   ;;  %v394_v21 = vld [vmem:[%s4854_s1 + $0x98] sm:$0xff] }
  0x33   : > { %2907 = vmatmul.msk.f32.gmra.mxu0 %vm828_vm1, %v378_v22  ;;  %2972 = vmatmul.msk.f32.gmra.mxu1 %vm828_vm1, %v378_v22 }
  0x36   : > { %626 = vperm.xlu1 %3065, %v464_v23  }
  0x37   : > { %541 = vperm.xlu0 %3064, %v447_v24   ;;  %536 = vperm.xlu2 %3066, %v446_v25  }
  0x3b   : > { %2908 = vmatmul.msk.f32.gmra.mxu0 %vm828_vm1, %v379_v26  ;;  %2973 = vmatmul.msk.f32.gmra.mxu1 %vm828_vm1, %v379_v26 }
  0x3e   : > { %531 = vperm.xlu1 %3065, %v445_v27  }
  0x3f   : > { %621 = vperm.xlu0 %3064, %v463_v28   ;;  %616 = vperm.xlu2 %3066, %v462_v29  }
  0x43   : > { %2909 = vmatmul.msk.f32.gmra.mxu0 %vm828_vm1, %v380_v30  ;;  %2974 = vmatmul.msk.f32.gmra.mxu1 %vm828_vm1, %v380_v30 }
  0x46   : > { %611 = vperm.xlu1 %3065, %v461_v31   ;;  %v395_v31 = vld [vmem:[%s4854_s1 + $0xa0] sm:$0xff] }
  0x47   : > { %526 = vperm.xlu0 %3064, %v444_v32   ;;  %521 = vperm.xlu2 %3066, %v443_v33  }
  0x4b   : > { %2910 = vmatmul.msk.f32.gmra.mxu0 %vm828_vm1, %v381_v34  ;;  %2975 = vmatmul.msk.f32.gmra.mxu1 %vm828_vm1, %v381_v34 }
  0x4e   : > { %516 = vperm.xlu1 %3065, %v442_v35  }
  0x4f   : > { %606 = vperm.xlu0 %3064, %v460_v36   ;;  %601 = vperm.xlu2 %3066, %v459_v37  }
  0x53   : > { %2911 = vmatmul.msk.f32.gmra.mxu0 %vm828_vm1, %v382_v38  ;;  %2976 = vmatmul.msk.f32.gmra.mxu1 %vm828_vm1, %v382_v38  ;;  %v396_v38 = vld [vmem:[%s4854_s1 + $0xa8] sm:$0xff] }
  0x56   : > { %596 = vperm.xlu1 %3065, %v458_v49  }
  0x57   : > { %511 = vperm.xlu0 %3064, %v441_v39   ;;  %506 = vperm.xlu2 %3066, %v440_v40  }
  0x5b   : > { %2912 = vmatmul.msk.f32.gmra.mxu0 %vm828_vm1, %v383_v41  ;;  %2977 = vmatmul.msk.f32.gmra.mxu1 %vm828_vm1, %v383_v41 }
  0x5e   : > { %586 = vperm.xlu1 %3065, %v456_v55  }
  0x5f   : > { %591 = vperm.xlu0 %3064, %v457_v54  }
  0x63   : > { %2913 = vmatmul.msk.f32.gmra.mxu0 %vm828_vm1, %v384_v42  ;;  %2978 = vmatmul.msk.f32.gmra.mxu1 %vm828_vm1, %v384_v42 }
  0x69   : > { %v3301_v43 = vpop.permute.xlu2 %656 }
  0x6b   : > { %2914 = vmatmul.msk.f32.gmra.mxu0 %vm828_vm1, %v385_v44  ;;  %2979 = vmatmul.msk.f32.gmra.mxu1 %vm828_vm1, %v385_v44 }
  0x71   : > { %v3308_v45 = vpop.permute.xlu2 %566 }
  0x73   : > { %2915 = vmatmul.msk.f32.gmra.mxu0 %vm828_vm1, %v386_v46  ;;  %2980 = vmatmul.msk.f32.gmra.mxu1 %vm828_vm1, %v386_v46 }
  0x79   : > { %v3315_v47 = vpop.permute.xlu2 %646 }
  0x7b   : > { %2916 = vmatmul.msk.f32.gmra.mxu0 %vm828_vm1, %v387_v48  ;;  %2981 = vmatmul.msk.f32.gmra.mxu1 %vm828_vm1, %v387_v48 }
  0x80   : > { %v3325_v50 = vpop.permute.xlu1 %661 }
  0x81   : > { %v3327_v51 = vpop.permute.xlu0 %581  ;;  %v3329_v52 = vpop.permute.xlu2 %551 }
  0x83   : > { %2917 = vmatmul.msk.f32.gmra.mxu0 %vm828_vm1, %v388_v53  ;;  %2982 = vmatmul.msk.f32.gmra.mxu1 %vm828_vm1, %v388_v53 }
  0x88   : > { %v3342_v56 = vpop.permute.xlu1 %571 }
  0x89   : > { %v3344_v57 = vpop.permute.xlu0 %576  ;;  %v3346_v58 = vpop.permute.xlu2 %631 }
  0x8b   : > { %2918 = vmatmul.msk.f32.gmra.mxu0 %vm828_vm1, %v389_v59  ;;  %2983 = vmatmul.msk.f32.gmra.mxu1 %vm828_vm1, %v389_v59  ;;  %v397_v59 = vld [vmem:[%s4854_s1 + $0xb0] sm:$0xff] }
  0x90   : > { %v3353_v60 = vpop.permute.xlu1 %561 }
  0x91   : > { %v3355_v61 = vpop.permute.xlu0 %651  ;;  %v3357_v62 = vpop.permute.xlu2 %536 }
  0x93   : > { %2919 = vmatmul.msk.f32.gmra.mxu0 %vm828_vm1, %v390_v63  ;;  %2984 = vmatmul.msk.f32.gmra.mxu1 %vm828_vm1, %v390_v63 }
  0x98   : > { %v3364_v0 = vpop.permute.xlu1 %641  ;;  %v1043_v4 = vpop.f32.mrf.mxu0 }
  0x99   : > { %v3366_v1 = vpop.permute.xlu0 %556  ;;  %v3368_v2 = vpop.permute.xlu2 %616 }
  0x9a   : > { %v1252_v5 = vpop.f32.mrf.mxu1 }
  0x9b   : > { %2920 = vmatmul.msk.f32.gmra.mxu0 %vm828_vm1, %v391_v3  ;;  %2985 = vmatmul.msk.f32.gmra.mxu1 %vm828_vm1, %v391_v3 }
  0xa0   : > { %v3375_v6 = vpop.permute.xlu1 %546  ;;  %v1046_v10 = vpop.f32.mrf.mxu0 }
  0xa1   : > { %v3377_v7 = vpop.permute.xlu0 %636  ;;  %v3379_v8 = vpop.permute.xlu2 %521 }
  0xa2   : > { %v1255_v11 = vpop.f32.mrf.mxu1 }
  0xa3   : > { %2921 = vmatmul.msk.f32.gmra.mxu0 %vm828_vm1, %v392_v9  ;;  %2986 = vmatmul.msk.f32.gmra.mxu1 %vm828_vm1, %v392_v9 }
  0xa8   : > { %v3386_v12 = vpop.permute.xlu1 %626  ;;  %v1049_v16 = vpop.f32.mrf.mxu0 }
  0xa9   : > { %v3388_v13 = vpop.permute.xlu0 %541  ;;  %v3390_v14 = vpop.permute.xlu2 %601 }
  0xaa   : > { %v1258_v17 = vpop.f32.mrf.mxu1 }
  0xab   : > { %2922 = vmatmul.msk.f32.gmra.mxu0 %vm828_vm1, %v393_v15  ;;  %2987 = vmatmul.msk.f32.gmra.mxu1 %vm828_vm1, %v393_v15 }
  0xb0   : > { %v532_v18 = vpop.permute.xlu1 %531  ;;  %v3402_v24 = vpop.f32.mrf.mxu0 }
  0xb1   : > { %v3397_v19 = vpop.permute.xlu0 %621  ;;  %v507_v20 = vpop.permute.xlu2 %506 }
  0xb2   : > { %v1044_v22 = vadd.f32 %v1043_v4, %v507_v20  ;;  %v1253_v23 = vadd.f32 %v1252_v5, %v507_v20  ;;  %v3404_v25 = vpop.f32.mrf.mxu1 }
  0xb3   : > { %2923 = vmatmul.msk.f32.gmra.mxu0 %vm828_vm1, %v394_v21  ;;  %2988 = vmatmul.msk.f32.gmra.mxu1 %vm828_vm1, %v394_v21 }
  0xb4   : > { %v1444_v26 = vmax.f32 %v1044_v22, 0.0  ;;  %v1445_v27 = vmax.f32 %v1253_v23, 0.0 }
  0xb6   : > { %v3408_v28 = vadd.f32 %v1445_v27, %v1444_v26 }
  0xb8   : > { %v3410_v29 = vpop.permute.xlu1 %611  ;;  %v3417_v32 = vpop.f32.mrf.mxu0 }
  0xb9   : > { %v3412_v30 = vpop.permute.xlu0 %526 }
  0xba   : > { %v3419_v33 = vpop.f32.mrf.mxu1 }
  0xbb   : > { %2924 = vmatmul.msk.f32.gmra.mxu0 %vm828_vm1, %v395_v31  ;;  %2989 = vmatmul.msk.f32.gmra.mxu1 %vm828_vm1, %v395_v31 }
  0xc0   : > { %v517_v34 = vpop.permute.xlu1 %516  ;;  %v1058_v39 = vpop.f32.mrf.mxu0 }
  0xc1   : > { %v3423_v35 = vpop.permute.xlu0 %606  ;;  %v1050_v36 = vadd.f32 %v1049_v16, %v517_v34  ;;  %v1259_v37 = vadd.f32 %v1258_v17, %v517_v34  ;;  %v1059_v44 = vadd.f32 %v1058_v39, %v532_v18 }
  0xc2   : > { %v1267_v40 = vpop.f32.mrf.mxu1 }
  0xc3   : > { %v1448_v41 = vmax.f32 %v1050_v36, 0.0  ;;  %v1449_v42 = vmax.f32 %v1259_v37, 0.0  ;;  %v1268_v46 = vadd.f32 %v1267_v40, %v532_v18  ;;  %2925 = vmatmul.msk.f32.gmra.mxu0 %vm828_vm1, %v396_v38  ;;  %2990 = vmatmul.msk.f32.gmra.mxu1 %vm828_vm1, %v396_v38  ;;  %v1454_v48 = vmax.f32 %v1059_v44, 0.0  ;;  %v399_v36 = vld [vmem:[%s4854_s1 + $0xc0] sm:$0xff]  ;;  %v400_v44 = vld [vmem:[%s4854_s1 + $0xc8] sm:$0xff] }
  0xc5   : > { %v1455_v49 = vmax.f32 %v1268_v46, 0.0  ;;  %v3430_v53 = vadd.f32 %v1449_v42, %v1448_v41 }
  0xc7   : > { %v1577_v54 = vadd.f32 %v1455_v49, %v1454_v48 }
  0xc8   : > { %v1061_v4 = vpop.f32.mrf.mxu0 }
  0xc9   : > { %v512_v55 = vpop.permute.xlu0 %511  ;;  %1905 = vadd.xlane.f32.xlu2 %v1577_v54  ;;  %v1062_v9 = vadd.f32 %v1061_v4, %v3357_v62 }
  0xca   : > { %v1047_v63 = vadd.f32 %v1046_v10, %v512_v55  ;;  %v1256_v3 = vadd.f32 %v1255_v11, %v512_v55  ;;  %v1270_v5 = vpop.f32.mrf.mxu1  ;;  %v398_v10 = vld [vmem:[%s4854_s1 + $0xb8] sm:$0xff] }
  0xcb   : > { %v1271_v15 = vadd.f32 %v1270_v5, %v3357_v62  ;;  %2926 = vmatmul.msk.f32.gmra.mxu0 %vm828_vm1, %v397_v59  ;;  %2991 = vmatmul.msk.f32.gmra.mxu1 %vm828_vm1, %v397_v59  ;;  %v1456_v18 = vmax.f32 %v1062_v9, 0.0 }
  0xcc   : > { %v1446_v16 = vmax.f32 %v1047_v63, 0.0  ;;  %v1447_v17 = vmax.f32 %v1256_v3, 0.0  ;;  %v401_v63 = vld [vmem:[%s4854_s1 + $0xd0] sm:$0xff] }
  0xcd   : > { %v1457_v20 = vmax.f32 %v1271_v15, 0.0 }
  0xce   : > { %v3439_v21 = vadd.f32 %v1447_v17, %v1446_v16  ;;  %v402_v17 = vld [vmem:[%s4854_s1 + $0xd8] sm:$0xff] }
  0xcf   : > { %v1578_v22 = vadd.f32 %v1457_v20, %v1456_v18 }
  0xd0   : > { %v1064_v11 = vpop.f32.mrf.mxu0 }
  0xd1   : > { %1907 = vadd.xlane.f32.xlu0 %v1578_v22  ;;  %v1065_v62 = vadd.f32 %v1064_v11, %v3388_v13 }
  0xd2   : > { %v1273_v23 = vpop.f32.mrf.mxu1 }
  0xd3   : > { %v1274_v26 = vadd.f32 %v1273_v23, %v3388_v13  ;;  %2927 = vmatmul.msk.f32.gmra.mxu0 %vm828_vm1, %v398_v10  ;;  %2992 = vmatmul.msk.f32.gmra.mxu1 %vm828_vm1, %v398_v10  ;;  %v1458_v27 = vmax.f32 %v1065_v62, 0.0  ;;  %v403_v62 = vld [vmem:[%s4854_s1 + $0xe0] sm:$0xff] }
  0xd5   : > { %v1459_v31 = vmax.f32 %v1274_v26, 0.0 }
  0xd7   : > { %v1579_v34 = vadd.f32 %v1459_v31, %v1458_v27 }
  0xd8   : > { %v1067_v37 = vpop.f32.mrf.mxu0 }
  0xd9   : > { %1909 = vadd.xlane.f32.xlu1 %v1579_v34  ;;  %v1068_v39 = vadd.f32 %v1067_v37, %v3375_v6 }
  0xda   : > { %v1276_v38 = vpop.f32.mrf.mxu1 }
  0xdb   : > { %v1277_v40 = vadd.f32 %v1276_v38, %v3375_v6  ;;  %2928 = vmatmul.msk.f32.gmra.mxu0 %vm828_vm1, %v399_v36  ;;  %2993 = vmatmul.msk.f32.gmra.mxu1 %vm828_vm1, %v399_v36  ;;  %v1460_v13 = vmax.f32 %v1068_v39, 0.0  ;;  %v404_v38 = vld [vmem:[%s4854_s1 + $0xe8] sm:$0xff] }
  0xdd   : > { %v1461_v41 = vmax.f32 %v1277_v40, 0.0 }
  0xdf   : > { %v1580_v42 = vadd.f32 %v1461_v41, %v1460_v13 }
  0xe0   : > { %v1070_v46 = vpop.f32.mrf.mxu0 }
  0xe1   : > { %1911 = vadd.xlane.f32.xlu2 %v1580_v42  ;;  %v1071_v49 = vadd.f32 %v1070_v46, %v3329_v52  ;;  %v405_v46 = vld [vmem:[%s4854_s1 + $0xf0] sm:$0xff] }
  0xe2   : > { %v1279_v48 = vpop.f32.mrf.mxu1 }
  0xe3   : > { %v1280_v54 = vadd.f32 %v1279_v48, %v3329_v52  ;;  %2929 = vmatmul.msk.f32.gmra.mxu0 %vm828_vm1, %v400_v44  ;;  %2994 = vmatmul.msk.f32.gmra.mxu1 %vm828_vm1, %v400_v44  ;;  %v1462_v6 = vmax.f32 %v1071_v49, 0.0 }
  0xe5   : > { %v1463_v55 = vmax.f32 %v1280_v54, 0.0 }
  0xe7   : > { %v1581_v59 = vadd.f32 %v1463_v55, %v1462_v6 }
  0xe8   : > { %v1073_v3 = vpop.f32.mrf.mxu0 }
  0xe9   : > { %1913 = vadd.xlane.f32.xlu0 %v1581_v59  ;;  %v1074_v5 = vadd.f32 %v1073_v3, %v3366_v1 }
  0xea   : > { %v1282_v4 = vpop.f32.mrf.mxu1 }
  0xeb   : > { %v1283_v9 = vadd.f32 %v1282_v4, %v3366_v1  ;;  %2930 = vmatmul.msk.f32.gmra.mxu0 %vm828_vm1, %v401_v63  ;;  %2995 = vmatmul.msk.f32.gmra.mxu1 %vm828_vm1, %v401_v63  ;;  %v1464_v52 = vmax.f32 %v1074_v5, 0.0  ;;  %v406_v63 = vld [vmem:[%s4854_s1 + $0xf8] sm:$0xff] }
  0xed   : > { %v1465_v15 = vmax.f32 %v1283_v9, 0.0 }
  0xef   : > { %v1582_v16 = vadd.f32 %v1465_v15, %v1464_v52 }
  0xf0   : > { %v1076_v18 = vpop.f32.mrf.mxu0 }
  0xf1   : > { %1915 = vadd.xlane.f32.xlu1 %v1582_v16  ;;  %v1077_v22 = vadd.f32 %v1076_v18, %v3353_v60  ;;  %v407_v16 = vld [vmem:[%s4854_s1 + $0x100] sm:$0xff] }
  0xf2   : > { %v1285_v20 = vpop.f32.mrf.mxu1 }
  0xf3   : > { %v1286_v10 = vadd.f32 %v1285_v20, %v3353_v60  ;;  %2931 = vmatmul.msk.f32.gmra.mxu0 %vm828_vm1, %v402_v17  ;;  %2996 = vmatmul.msk.f32.gmra.mxu1 %vm828_vm1, %v402_v17  ;;  %v1466_v1 = vmax.f32 %v1077_v22, 0.0 }
  0xf5   : > { %v1467_v11 = vmax.f32 %v1286_v10, 0.0  ;;  %v409_v10 = vld [vmem:[%s4854_s1 + $0x110] sm:$0xff] }
  0xf7   : > { %v1583_v23 = vadd.f32 %v1467_v11, %v1466_v1 }
  0xf8   : > { %v1079_v26 = vpop.f32.mrf.mxu0 }
  0xf9   : > { %1917 = vadd.xlane.f32.xlu2 %v1583_v23  ;;  %v1080_v31 = vadd.f32 %v1079_v26, %v3308_v45  ;;  %v410_v23 = vld [vmem:[%s4854_s1 + $0x118] sm:$0xff] }
  0xfa   : > { %v1288_v27 = vpop.f32.mrf.mxu1 }
  0xfb   : > { %v1289_v34 = vadd.f32 %v1288_v27, %v3308_v45  ;;  %2932 = vmatmul.msk.f32.gmra.mxu0 %vm828_vm1, %v403_v62  ;;  %2997 = vmatmul.msk.f32.gmra.mxu1 %vm828_vm1, %v403_v62  ;;  %v1468_v60 = vmax.f32 %v1080_v31, 0.0  ;;  %v411_v27 = vld [vmem:[%s4854_s1 + $0x120] sm:$0xff] }
  0xfd   : > { %v1469_v36 = vmax.f32 %v1289_v34, 0.0 }
  0xff   : > { %v1584_v37 = vadd.f32 %v1469_v36, %v1468_v60  ;;  %v412_v60 = vld [vmem:[%s4854_s1 + $0x128] sm:$0xff] }
 0x100   : > { %v1082_v39 = vpop.f32.mrf.mxu0 }
 0x101   : > { %1919 = vadd.xlane.f32.xlu0 %v1584_v37  ;;  %v1083_v13 = vadd.f32 %v1082_v39, %v3342_v56 }
 0x102   : > { %v1291_v40 = vpop.f32.mrf.mxu1 }
 0x103   : > { %v1292_v41 = vadd.f32 %v1291_v40, %v3342_v56  ;;  %2933 = vmatmul.msk.f32.gmra.mxu0 %vm828_vm1, %v404_v38  ;;  %2998 = vmatmul.msk.f32.gmra.mxu1 %vm828_vm1, %v404_v38  ;;  %v1470_v45 = vmax.f32 %v1083_v13, 0.0  ;;  %v413_v38 = vld [vmem:[%s4854_s1 + $0x130] sm:$0xff] }
 0x105   : > { %v1471_v42 = vmax.f32 %v1292_v41, 0.0 }
 0x107   : > { %v1585_v44 = vadd.f32 %v1471_v42, %v1470_v45 }
 0x108   : > { %v1085_v48 = vpop.f32.mrf.mxu0 }
 0x109   : > { %1921 = vadd.xlane.f32.xlu2 %v1585_v44  ;;  %v1086_v54 = vadd.f32 %v1085_v48, %v3344_v57 }
 0x10a   : > { %v1294_v49 = vpop.f32.mrf.mxu1 }
 0x10b   : > { %v1295_v6 = vadd.f32 %v1294_v49, %v3344_v57  ;;  %2934 = vmatmul.msk.f32.gmra.mxu0 %vm828_vm1, %v405_v46  ;;  %2999 = vmatmul.msk.f32.gmra.mxu1 %vm828_vm1, %v405_v46  ;;  %v1472_v56 = vmax.f32 %v1086_v54, 0.0  ;;  %v414_v46 = vld [vmem:[%s4854_s1 + $0x138] sm:$0xff] }
 0x10d   : > { %v1473_v55 = vmax.f32 %v1295_v6, 0.0 }
 0x10f   : > { %v1586_v59 = vadd.f32 %v1473_v55, %v1472_v56 }
 0x110   : > { %v1088_v3 = vpop.f32.mrf.mxu0 }
 0x111   : > { %1923 = vadd.xlane.f32.xlu0 %v1586_v59  ;;  %v1089_v5 = vadd.f32 %v1088_v3, %v3327_v51  ;;  %v415_v59 = vld [vmem:[%s4854_s1 + $0x140] sm:$0xff] }
 0x112   : > { %v1297_v4 = vpop.f32.mrf.mxu1 }
 0x113   : > { %v1298_v9 = vadd.f32 %v1297_v4, %v3327_v51  ;;  %2935 = vmatmul.msk.f32.gmra.mxu0 %vm828_vm1, %v406_v63  ;;  %3000 = vmatmul.msk.f32.gmra.mxu1 %vm828_vm1, %v406_v63  ;;  %v1474_v57 = vmax.f32 %v1089_v5, 0.0  ;;  %v408_v51 = vld [vmem:[%s4854_s1 + $0x108] sm:$0xff] }
 0x115   : > { %v1475_v52 = vmax.f32 %v1298_v9, 0.0 }
 0x117   : > { %v1587_v15 = vadd.f32 %v1475_v52, %v1474_v57  ;;  %v416_v52 = vld [vmem:[%s4854_s1 + $0x148] sm:$0xff] }
 0x118   : > { %v3507_v17 = vpop.f32.mrf.mxu0 }
 0x119   : > { %1925 = vadd.xlane.f32.xlu2 %v1587_v15 }
 0x11a   : > { %v3509_v18 = vpop.f32.mrf.mxu1 }
 0x11b   : > { %2936 = vmatmul.msk.f32.gmra.mxu0 %vm828_vm1, %v407_v16  ;;  %3001 = vmatmul.msk.f32.gmra.mxu1 %vm828_vm1, %v407_v16 }
 0x120   : > { %v3516_v20 = vpop.f32.mrf.mxu0 }
 0x122   : > { %v3518_v22 = vpop.f32.mrf.mxu1 }
 0x123   : > { %2937 = vmatmul.msk.f32.gmra.mxu0 %vm828_vm1, %v408_v51  ;;  %3002 = vmatmul.msk.f32.gmra.mxu1 %vm828_vm1, %v408_v51 }
 0x128   : > { %v3525_v1 = vpop.f32.mrf.mxu0 }
 0x12a   : > { %v3527_v11 = vpop.f32.mrf.mxu1 }
 0x12b   : > { %2938 = vmatmul.msk.f32.gmra.mxu0 %vm828_vm1, %v409_v10  ;;  %3003 = vmatmul.msk.f32.gmra.mxu1 %vm828_vm1, %v409_v10 }
 0x130   : > { %v3534_v62 = vpop.f32.mrf.mxu0 }
 0x132   : > { %v3536_v26 = vpop.f32.mrf.mxu1 }
 0x133   : > { %2939 = vmatmul.msk.f32.gmra.mxu0 %vm828_vm1, %v410_v23  ;;  %3004 = vmatmul.msk.f32.gmra.mxu1 %vm828_vm1, %v410_v23 }
 0x138   : > { %v3543_v31 = vpop.f32.mrf.mxu0 }
 0x13a   : > { %v3545_v34 = vpop.f32.mrf.mxu1 }
 0x13b   : > { %2940 = vmatmul.msk.f32.gmra.mxu0 %vm828_vm1, %v411_v27  ;;  %3005 = vmatmul.msk.f32.gmra.mxu1 %vm828_vm1, %v411_v27 }
 0x140   : > { %v3552_v36 = vpop.f32.mrf.mxu0 }
 0x142   : > { %v3554_v37 = vpop.f32.mrf.mxu1 }
 0x143   : > { %2941 = vmatmul.msk.f32.gmra.mxu0 %vm828_vm1, %v412_v60  ;;  %3006 = vmatmul.msk.f32.gmra.mxu1 %vm828_vm1, %v412_v60  ;;  %v417_v60 = vld [vmem:[%s4854_s1 + $0x150] sm:$0xff] }
 0x148   : > { %v1109_v39 = vpop.f32.mrf.mxu0 }
 0x149   : > { %v1110_v13 = vadd.f32 %v1109_v39, %v3368_v2 }
 0x14a   : > { %v1318_v40 = vpop.f32.mrf.mxu1 }
 0x14b   : > { %v1319_v41 = vadd.f32 %v1318_v40, %v3368_v2  ;;  %2942 = vmatmul.msk.f32.gmra.mxu0 %vm828_vm1, %v413_v38  ;;  %3007 = vmatmul.msk.f32.gmra.mxu1 %vm828_vm1, %v413_v38  ;;  %v1488_v45 = vmax.f32 %v1110_v13, 0.0 }
 0x14d   : > { %v1489_v42 = vmax.f32 %v1319_v41, 0.0  ;;  %v3591_v41 = vpop.permute.xlu0 %591 }
 0x14f   : > { %v1594_v44 = vadd.f32 %v1489_v42, %v1488_v45 }
 0x150   : > { %v1112_v48 = vpop.f32.mrf.mxu0 }
 0x151   : > { %1939 = vadd.xlane.f32.xlu0 %v1594_v44  ;;  %v1113_v54 = vadd.f32 %v1112_v48, %v3397_v19 }
 0x152   : > { %v1321_v49 = vpop.f32.mrf.mxu1 }
 0x153   : > { %v1322_v6 = vadd.f32 %v1321_v49, %v3397_v19  ;;  %2943 = vmatmul.msk.f32.gmra.mxu0 %vm828_vm1, %v414_v46  ;;  %3008 = vmatmul.msk.f32.gmra.mxu1 %vm828_vm1, %v414_v46  ;;  %v1490_v2 = vmax.f32 %v1113_v54, 0.0  ;;  %v418_v46 = vld [vmem:[%s4854_s1 + $0x158] sm:$0xff] }
 0x155   : > { %v1491_v56 = vmax.f32 %v1322_v6, 0.0  ;;  %v3602_v6 = vpop.xlane.xlu0 %1907 }
 0x157   : > { %v1595_v55 = vadd.f32 %v1491_v56, %v1490_v2 }
 0x158   : > { %v1115_v63 = vpop.f32.mrf.mxu0 }
 0x159   : > { %1941 = vadd.xlane.f32.xlu1 %v1595_v55  ;;  %v1116_v4 = vadd.f32 %v1115_v63, %v3386_v12  ;;  %v419_v63 = vld [vmem:[%s4854_s1 + $0x160] sm:$0xff] }
 0x15a   : > { %v1324_v3 = vpop.f32.mrf.mxu1 }
 0x15b   : > { %v1325_v5 = vadd.f32 %v1324_v3, %v3386_v12  ;;  %2944 = vmatmul.msk.f32.gmra.mxu0 %vm828_vm1, %v415_v59  ;;  %3009 = vmatmul.msk.f32.gmra.mxu1 %vm828_vm1, %v415_v59  ;;  %v1492_v19 = vmax.f32 %v1116_v4, 0.0 }
 0x15d   : > { %v1493_v9 = vmax.f32 %v1325_v5, 0.0  ;;  %v3611_v5 = vpop.permute.xlu1 %596 }
 0x15f   : > { %v1596_v57 = vadd.f32 %v1493_v9, %v1492_v19  ;;  %v3615_v9 = vpop.xlane.xlu0 %1913 }
 0x160   : > { %v1118_v15 = vpop.f32.mrf.mxu0 }
 0x161   : > { %1943 = vadd.xlane.f32.xlu2 %v1596_v57  ;;  %v1119_v51 = vadd.f32 %v1118_v15, %v3346_v58 }
 0x162   : > { %v1327_v16 = vpop.f32.mrf.mxu1 }
 0x163   : > { %v1328_v10 = vadd.f32 %v1327_v16, %v3346_v58  ;;  %2945 = vmatmul.msk.f32.gmra.mxu0 %vm828_vm1, %v416_v52  ;;  %3010 = vmatmul.msk.f32.gmra.mxu1 %vm828_vm1, %v416_v52  ;;  %v1494_v12 = vmax.f32 %v1119_v51, 0.0  ;;  %v3593_v58 = vpop.xlane.xlu2 %1905  ;;  %v1053_v16 = vadd.f32 %v3402_v24, %v3379_v8  ;;  %v1262_v51 = vadd.f32 %v3404_v25, %v3379_v8 }
 0x165   : > { %v1495_v23 = vmax.f32 %v1328_v10, 0.0  ;;  %v3632_v8 = vpop.permute.xlu1 %586 }
 0x167   : > { %v1597_v27 = vadd.f32 %v1495_v23, %v1494_v12 }
 0x168   : > { %v1121_v38 = vpop.f32.mrf.mxu0 }
 0x169   : > { %1945 = vadd.xlane.f32.xlu0 %v1597_v27  ;;  %v1122_v40 = vadd.f32 %v1121_v38, %v3377_v7  ;;  %v1450_v27 = vmax.f32 %v1053_v16, 0.0  ;;  %v422_v16 = vld [vmem:[%s4854_s1 + $0x178] sm:$0xff] }
 0x16a   : > { %v1330_v39 = vpop.f32.mrf.mxu1 }
 0x16b   : > { %v1331_v13 = vadd.f32 %v1330_v39, %v3377_v7  ;;  %2946 = vmatmul.msk.f32.gmra.mxu0 %vm828_vm1, %v417_v60  ;;  %3011 = vmatmul.msk.f32.gmra.mxu1 %vm828_vm1, %v417_v60  ;;  %v1496_v45 = vmax.f32 %v1122_v40, 0.0  ;;  %v3604_v2 = vpop.xlane.xlu2 %1911  ;;  %v1451_v60 = vmax.f32 %v1262_v51, 0.0 }
 0x16d   : > { %v1497_v42 = vmax.f32 %v1331_v13, 0.0 }
 0x16f   : > { %v1598_v44 = vadd.f32 %v1497_v42, %v1496_v45  ;;  %v1575_v42 = vadd.f32 %v1451_v60, %v1450_v27 }
 0x170   : > { %v1124_v48 = vpop.f32.mrf.mxu0 }
 0x171   : > { %1947 = vadd.xlane.f32.xlu1 %v1598_v44  ;;  %v1125_v7 = vadd.f32 %v1124_v48, %v3364_v0  ;;  %v1101_v44 = vadd.f32 %v3534_v62, %v3390_v14 }
 0x172   : > { %v1333_v49 = vpop.f32.mrf.mxu1 }
 0x173   : > { %v1334_v54 = vadd.f32 %v1333_v49, %v3364_v0  ;;  %2947 = vmatmul.msk.f32.gmra.mxu0 %vm828_vm1, %v418_v46  ;;  %3012 = vmatmul.msk.f32.gmra.mxu1 %vm828_vm1, %v418_v46  ;;  %v1498_v56 = vmax.f32 %v1125_v7, 0.0  ;;  %v3617_v57 = vpop.xlane.xlu2 %1917  ;;  %v1310_v46 = vadd.f32 %v3536_v26, %v3390_v14  ;;  %v1910_v14 = vpop.xlane.xlu1 %1909 }
 0x174   : > { %v1920_v40 = vpop.xlane.xlu0 %1919  ;;  %v2034_v27 = vmul.f32 0.00390625, %v3617_v57 }
 0x175   : > { %v1499_v55 = vmax.f32 %v1334_v54, 0.0 }
 0x177   : > { %v1599_v59 = vadd.f32 %v1499_v55, %v1498_v56  ;;  %v1482_v56 = vmax.f32 %v1101_v44, 0.0  ;;  %v1483_v55 = vmax.f32 %v1310_v46, 0.0  ;;  %v2030_v44 = vmul.f32 0.00390625, %v1910_v14 }
 0x178   : > { %v1127_v3 = vpop.f32.mrf.mxu0 }
 0x179   : > { %1949 = vadd.xlane.f32.xlu2 %v1599_v59  ;;  %v1128_v0 = vadd.f32 %v1127_v3, %v3315_v47 }
 0x17a   : > { %v1336_v4 = vpop.f32.mrf.mxu1 }
 0x17b   : > { %v1337_v19 = vadd.f32 %v1336_v4, %v3315_v47  ;;  %2948 = vmatmul.msk.f32.gmra.mxu0 %vm828_vm1, %v419_v63  ;;  %3013 = vmatmul.msk.f32.gmra.mxu1 %vm828_vm1, %v419_v63  ;;  %v1500_v52 = vmax.f32 %v1128_v0, 0.0  ;;  %v420_v47 = vld [vmem:[%s4854_s1 + $0x168] sm:$0xff]  ;;  %v1107_v4 = vadd.f32 %v3552_v36, %v3410_v29  ;;  %v1316_v0 = vadd.f32 %v3554_v37, %v3410_v29  ;;  %v1916_v37 = vpop.xlane.xlu1 %1915 }
 0x17c   : > { %v1922_v13 = vpop.xlane.xlu2 %1921  ;;  %v2035_v36 = vmul.f32 0.00390625, %v1920_v40  ;;  %v1265_v40 = vadd.f32 %v3419_v33, %v3412_v30  ;;  %v2031_v33 = vmul.f32 0.00390625, %v3604_v2  ;;  %v1313_v2 = vadd.f32 %v3545_v34, %v3423_v35 }
 0x17d   : > { %v1501_v15 = vmax.f32 %v1337_v19, 0.0  ;;  %v1486_v51 = vmax.f32 %v1107_v4, 0.0 }
 0x17e   : > { %v1485_v34 = vmax.f32 %v1313_v2, 0.0  ;;  %v499_v2 = vld [vmem:[%s4855_s2 + $0x1d8] sm:$0xff] }
 0x17f   : > { %v1600_v10 = vadd.f32 %v1501_v15, %v1500_v52  ;;  %v1591_v52 = vadd.f32 %v1483_v55, %v1482_v56  ;;  %v2036_v15 = vmul.f32 0.00390625, %v1922_v13  ;;  %v425_v56 = vld [vmem:[%s4854_s1 + $0x190] sm:$0xff] }
 0x180   : > { %v1130_v12 = vpop.f32.mrf.mxu0 }
 0x181   : > { %1951 = vadd.xlane.f32.xlu0 %v1600_v10  ;;  %v1131_v38 = vadd.f32 %v1130_v12, %v3355_v61  ;;  %v1487_v12 = vmax.f32 %v1316_v0, 0.0 }
 0x182   : > { %v1339_v23 = vpop.f32.mrf.mxu1 }
 0x183   : > { %v1340_v39 = vadd.f32 %v1339_v23, %v3355_v61  ;;  %2949 = vmatmul.msk.f32.gmra.mxu0 %vm828_vm1, %v420_v47  ;;  %3014 = vmatmul.msk.f32.gmra.mxu1 %vm828_vm1, %v420_v47  ;;  %v1502_v24 = vmax.f32 %v1131_v38, 0.0  ;;  %v421_v61 = vld [vmem:[%s4854_s1 + $0x170] sm:$0xff] }
 0x184   : > { %v1924_v59 = vpop.xlane.xlu0 %1923 }
 0x185   : > { %v1503_v25 = vmax.f32 %v1340_v39, 0.0  ;;  %v2037_v19 = vmul.f32 0.00390625, %v1924_v59  ;;  %v1056_v39 = vadd.f32 %v3417_v32, %v3412_v30 }
 0x187   : > { %v1601_v45 = vadd.f32 %v1503_v25, %v1502_v24  ;;  %v2033_v24 = vmul.f32 0.00390625, %v1916_v37  ;;  %v423_v25 = vld [vmem:[%s4854_s1 + $0x180] sm:$0xff]  ;;  %v1452_v57 = vmax.f32 %v1056_v39, 0.0  ;;  %v501_v37 = vld [vmem:[%s4855_s2 + $0x1e8] sm:$0xff] }
 0x188   : > { %v1133_v48 = vpop.f32.mrf.mxu0 }
 0x189   : > { %1953 = vadd.xlane.f32.xlu1 %v1601_v45  ;;  %1901 = vadd.xlane.f32.xlu0 %v1575_v42  ;;  %v1134_v7 = vadd.f32 %v1133_v48, %v3301_v43  ;;  %v1453_v45 = vmax.f32 %v1265_v40, 0.0  ;;  %v2032_v42 = vmul.f32 0.00390625, %v3615_v9  ;;  %v1098_v9 = vadd.f32 %v3525_v1, %v3611_v5  ;;  %v497_v40 = vld [vmem:[%s4855_s2 + $0x1c8] sm:$0xff] }
 0x18a   : > { %v1342_v49 = vpop.f32.mrf.mxu1  ;;  %v2029_v48 = vmul.f32 0.00390625, %v3602_v6  ;;  %v2028_v1 = vmul.f32 0.00390625, %v3593_v58  ;;  %v1301_v58 = vadd.f32 %v3509_v18, %v3632_v8  ;;  %v1095_v18 = vadd.f32 %v3516_v20, %v3591_v41  ;;  %v485_v20 = vld [vmem:[%s4855_s2 + $0x168] sm:$0xff] }
 0x18b   : > { %v1343_v54 = vadd.f32 %v1342_v49, %v3301_v43  ;;  %2950 = vmatmul.msk.f32.gmra.mxu0 %vm828_vm1, %v421_v61  ;;  %3015 = vmatmul.msk.f32.gmra.mxu1 %vm828_vm1, %v421_v61  ;;  %v1504_v62 = vmax.f32 %v1134_v7, 0.0  ;;  %v1576_v46 = vadd.f32 %v1453_v45, %v1452_v57  ;;  %v1104_v61 = vadd.f32 %v3543_v31, %v3423_v35  ;;  %v424_v49 = vld [vmem:[%s4854_s1 + $0x188] sm:$0xff]  ;;  %v478_v45 = vld [vmem:[%s4855_s2 + $0x130] sm:$0xff] }
 0x18c   : > { %v1926_v63 = vpop.xlane.xlu2 %1925  ;;  %v1480_v31 = vmax.f32 %v1098_v9, 0.0  ;;  %v1477_v14 = vmax.f32 %v1301_v58, 0.0  ;;  %v1478_v0 = vmax.f32 %v1095_v18, 0.0  ;;  %v434_v58 = vld [vmem:[%s4854_s1 + $0x1d8] sm:$0xff]  ;;  %v496_v18 = vld [vmem:[%s4855_s2 + $0x1c0] sm:$0xff] }
 0x18d   : > { %v1505_v26 = vmax.f32 %v1343_v54, 0.0  ;;  %v2038_v3 = vmul.f32 0.00390625, %v1926_v63  ;;  %v1484_v35 = vmax.f32 %v1104_v61, 0.0  ;;  %v479_v61 = vld [vmem:[%s4855_s2 + $0x138] sm:$0xff] }
 0x18f   : > { %2247 = vmatpush.msra.mxu2 %v2038_v3  ;;  %v1602_v43 = vadd.f32 %v1505_v26, %v1504_v62  ;;  %v1592_v6 = vadd.f32 %v1485_v34, %v1484_v35  ;;  %v426_v26 = vld [vmem:[%s4854_s1 + $0x198] sm:$0xff]  ;;  %v480_v34 = vld [vmem:[%s4855_s2 + $0x140] sm:$0xff] }
 0x190   : > { %v1136_v10 = vpop.f32.mrf.mxu0  ;;  %v495_v35 = vld [vmem:[%s4855_s2 + $0x1b8] sm:$0xff] }
 0x191   : > { %1955 = vadd.xlane.f32.xlu2 %v1602_v43  ;;  %2248 = vmatpush.msra.mxu2 %v2037_v19  ;;  %v1137_v23 = vadd.f32 %v1136_v10, %v3325_v50  ;;  %v500_v10 = vld [vmem:[%s4855_s2 + $0x1e0] sm:$0xff] }
 0x192   : > { %1933 = vadd.xlane.f32.xlu0 %v1591_v52  ;;  %v1345_v47 = vpop.f32.mrf.mxu1  ;;  %v484_v52 = vld [vmem:[%s4855_s2 + $0x160] sm:$0xff] }
 0x193   : > { %v1346_v29 = vadd.f32 %v1345_v47, %v3325_v50  ;;  %2249 = vmatpush.msra.mxu2 %v2036_v15  ;;  %2951 = vmatmul.msk.f32.gmra.mxu0 %vm828_vm1, %v422_v16  ;;  %v1506_v60 = vmax.f32 %v1137_v23, 0.0  ;;  %v1593_v50 = vadd.f32 %v1487_v12, %v1486_v51  ;;  %v428_v15 = vld [vmem:[%s4854_s1 + $0x1a8] sm:$0xff]  ;;  %v503_v47 = vld [vmem:[%s4855_s2 + $0x1f8] sm:$0xff]  ;;  %v429_v12 = vld [vmem:[%s4854_s1 + $0x1b0] sm:$0xff] }
 0x194   : > { %3016 = vmatmul.msk.f32.gmra.mxu1 %vm828_vm1, %v422_v16 }
 0x195   : > { %v1507_v38 = vmax.f32 %v1346_v29, 0.0  ;;  %2250 = vmatpush.msra.mxu2 %v2035_v36  ;;  %v481_v29 = vld [vmem:[%s4855_s2 + $0x148] sm:$0xff] }
 0x197   : > { %2251 = vmatpush.msra.mxu2 %v2034_v27  ;;  %v1603_v13 = vadd.f32 %v1507_v38, %v1506_v60  ;;  %v486_v27 = vld [vmem:[%s4855_s2 + $0x170] sm:$0xff]  ;;  %v430_v60 = vld [vmem:[%s4854_s1 + $0x1b8] sm:$0xff] }
 0x198   : > { %v3666_v32 = vpop.f32.mrf.mxu0 }
 0x199   : > { %1957 = vadd.xlane.f32.xlu1 %v1603_v13  ;;  %1937 = vadd.xlane.f32.xlu2 %v1593_v50  ;;  %v482_v13 = vld [vmem:[%s4855_s2 + $0x150] sm:$0xff] }
 0x19a   : > { %2252 = vmatpush.msra.mxu2 %v2033_v24  ;;  %1895 = vadd.xlane.f32.xlu0 %v3408_v28  ;;  %v3668_v30 = vpop.f32.mrf.mxu1  ;;  %v1307_v28 = vadd.f32 %v3527_v11, %v3611_v5  ;;  %v502_v50 = vld [vmem:[%s4855_s2 + $0x1f0] sm:$0xff]  ;;  %v431_v24 = vld [vmem:[%s4854_s1 + $0x1c0] sm:$0xff] }
 0x19b   : > { %2952 = vmatmul.msk.f32.gmra.mxu0 %vm828_vm1, %v423_v25 }
 0x19c   : > { %2253 = vmatpush.msra.mxu2 %v2032_v42  ;;  %3017 = vmatmul.msk.f32.gmra.mxu1 %vm828_vm1, %v423_v25  ;;  %v1481_v7 = vmax.f32 %v1307_v28, 0.0  ;;  %v498_v42 = vld [vmem:[%s4855_s2 + $0x1d0] sm:$0xff] }
 0x19d   : > { %v494_v28 = vld [vmem:[%s4855_s2 + $0x1b0] sm:$0xff] }
 0x19e   : > { %2254 = vmatpush.msra.mxu2 %v2031_v33  ;;  %v1590_v54 = vadd.f32 %v1481_v7, %v1480_v31  ;;  %v483_v33 = vld [vmem:[%s4855_s2 + $0x158] sm:$0xff] }
 0x19f   : > { %v475_v7 = vld [vmem:[%s4855_s2 + $0x118] sm:$0xff] }
 0x1a0   : > { %2255 = vmatpush.msra.mxu2 %v2030_v44  ;;  %v3687_v11 = vpop.f32.mrf.mxu0  ;;  %v432_v44 = vld [vmem:[%s4854_s1 + $0x1c8] sm:$0xff] }
 0x1a1   : > { %1903 = vadd.xlane.f32.xlu1 %v1576_v46  ;;  %1899 = vadd.xlane.f32.xlu2 %v3430_v53  ;;  %v1092_v53 = vadd.f32 %v3507_v17, %v3632_v8  ;;  %v487_v17 = vld [vmem:[%s4855_s2 + $0x178] sm:$0xff]  ;;  %v1304_v8 = vadd.f32 %v3518_v22, %v3591_v41  ;;  %v427_v22 = vld [vmem:[%s4854_s1 + $0x1a0] sm:$0xff] }
 0x1a2   : > { %2256 = vmatpush.msra.mxu2 %v2029_v48  ;;  %v3689_v5 = vpop.f32.mrf.mxu1 }
 0x1a3   : > { %2953 = vmatmul.msk.f32.gmra.mxu0 %vm828_vm1, %v424_v49  ;;  %v1476_v63 = vmax.f32 %v1092_v53, 0.0  ;;  %v1479_v19 = vmax.f32 %v1304_v8, 0.0 }
 0x1a4   : > { %2257 = vmatpush.msra.mxu2 %v2028_v1  ;;  %3018 = vmatmul.msk.f32.gmra.mxu1 %vm828_vm1, %v424_v49  ;;  %v433_v49 = vld [vmem:[%s4854_s1 + $0x1d0] sm:$0xff] }
 0x1a5   : > { %v1588_v62 = vadd.f32 %v1477_v14, %v1476_v63  ;;  %v491_v63 = vld [vmem:[%s4855_s2 + $0x198] sm:$0xff] }
 0x1a8   : > { %v3700_v55 = vpop.f32.mrf.mxu0 }
 0x1a9   : > { %1935 = vadd.xlane.f32.xlu1 %v1592_v6  ;;  %1931 = vadd.xlane.f32.xlu2 %v1590_v54 }
 0x1aa   : > { %v3702_v59 = vpop.f32.mrf.mxu1 }
 0x1ab   : > { %2954 = vmatmul.msk.f32.gmra.mxu0 %vm828_vm1, %v425_v56 }
 0x1ac   : > { %3019 = vmatmul.msk.f32.gmra.mxu1 %vm828_vm1, %v425_v56 }
 0x1ae   : > { %741 = vperm.xlu0 %3064, %v487_v17   ;;  %v476_v17 = vld [vmem:[%s4855_s2 + $0x120] sm:$0xff] }
 0x1b0   : > { %v3717_v3 = vpop.f32.mrf.mxu0 }
 0x1b1   : > { %1927 = vadd.xlane.f32.xlu2 %v1588_v62  ;;  %1897 = vadd.xlane.f32.xlu1 %v3439_v21  ;;  %v1589_v21 = vadd.f32 %v1479_v19, %v1478_v0  ;;  %v435_v62 = vld [vmem:[%s4854_s1 + $0x1e0] sm:$0xff] }
 0x1b2   : > { %v3719_v4 = vpop.f32.mrf.mxu1 }
 0x1b3   : > { %2955 = vmatmul.msk.f32.gmra.mxu0 %vm828_vm1, %v426_v26 }
 0x1b4   : > { %3020 = vmatmul.msk.f32.gmra.mxu1 %vm828_vm1, %v426_v26 }
 0x1b6   : > { %731 = vperm.xlu0 %3064, %v485_v20   ;;  %v472_v20 = vld [vmem:[%s4855_s2 + $0x100] sm:$0xff] }
 0x1b8   : > { %v3729_v41 = vpop.f32.mrf.mxu0 }
 0x1b9   : > { %1929 = vadd.xlane.f32.xlu1 %v1589_v21 }
 0x1ba   : > { %v3731_v43 = vpop.f32.mrf.mxu1 }
 0x1bb   : > { %2956 = vmatmul.msk.f32.gmra.mxu0 %vm828_vm1, %v427_v22 }
 0x1bc   : > { %3021 = vmatmul.msk.f32.gmra.mxu1 %vm828_vm1, %v427_v22  ;;  %v492_v22 = vld [vmem:[%s4855_s2 + $0x1a0] sm:$0xff] }
 0x1be   : > { %726 = vperm.xlu0 %3064, %v484_v52   ;;  %v477_v52 = vld [vmem:[%s4855_s2 + $0x128] sm:$0xff] }
 0x1c0   : > { %v3741_v16 = vpop.f32.mrf.mxu0 }
 0x1c2   : > { %v3743_v51 = vpop.f32.mrf.mxu1 }
 0x1c3   : > { %2957 = vmatmul.msk.f32.gmra.mxu0 %vm828_vm1, %v428_v15 }
 0x1c4   : > { %3022 = vmatmul.msk.f32.gmra.mxu1 %vm828_vm1, %v428_v15  ;;  %v3825_v48 = vpop.xlane.xlu0 %1939  ;;  %v436_v15 = vld [vmem:[%s4854_s1 + $0x1e8] sm:$0xff] }
 0x1c6   : > { %806 = vperm.xlu0 %3064, %v500_v10  }
 0x1c8   : > { %v3756_v36 = vpop.f32.mrf.mxu0 }
 0x1c9   : > { %821 = vperm.xlu2 %3066, %v503_v47  }
 0x1ca   : > { %v3758_v23 = vpop.f32.mrf.mxu1 }
 0x1cb   : > { %2958 = vmatmul.msk.f32.gmra.mxu0 %vm828_vm1, %v429_v12 }
 0x1cc   : > { %3023 = vmatmul.msk.f32.gmra.mxu1 %vm828_vm1, %v429_v12  ;;  %v3854_v56 = vpop.xlane.xlu1 %1941 }
 0x1ce   : > { %711 = vperm.xlu0 %3064, %v481_v29  }
 0x1d0   : > { %v3774_v38 = vpop.f32.mrf.mxu0 }
 0x1d1   : > { %811 = vperm.xlu2 %3066, %v501_v37  }
 0x1d2   : > { %v3776_v39 = vpop.f32.mrf.mxu1  ;;  %736 = vperm.xlu1 %3065, %v486_v27   ;;  %v473_v27 = vld [vmem:[%s4855_s2 + $0x108] sm:$0xff] }
 0x1d3   : > { %2959 = vmatmul.msk.f32.gmra.mxu0 %vm828_vm1, %v430_v60 }
 0x1d4   : > { %3024 = vmatmul.msk.f32.gmra.mxu1 %vm828_vm1, %v430_v60  ;;  %v3859_v14 = vpop.xlane.xlu2 %1943  ;;  %v493_v60 = vld [vmem:[%s4855_s2 + $0x1a8] sm:$0xff] }
 0x1d6   : > { %791 = vperm.xlu0 %3064, %v497_v40   ;;  %v437_v40 = vld [vmem:[%s4854_s1 + $0x1f0] sm:$0xff] }
 0x1d8   : > { %v3792_v25 = vpop.f32.mrf.mxu0 }
 0x1d9   : > { %716 = vperm.xlu2 %3066, %v482_v13  }
 0x1da   : > { %v3794_v57 = vpop.f32.mrf.mxu1  ;;  %816 = vperm.xlu1 %3065, %v502_v50  }
 0x1db   : > { %2960 = vmatmul.msk.f32.gmra.mxu0 %vm828_vm1, %v431_v24 }
 0x1dc   : > { %3025 = vmatmul.msk.f32.gmra.mxu1 %vm828_vm1, %v431_v24  ;;  %v3845_v53 = vpop.xlane.xlu0 %1945 }
 0x1de   : > { %696 = vperm.xlu0 %3064, %v478_v45  }
 0x1e0   : > { %v3810_v46 = vpop.f32.mrf.mxu0 }
 0x1e1   : > { %796 = vperm.xlu2 %3066, %v498_v42  }
 0x1e2   : > { %v3812_v9 = vpop.f32.mrf.mxu1  ;;  %721 = vperm.xlu1 %3065, %v483_v33  }
 0x1e3   : > { %2961 = vmatmul.msk.f32.gmra.mxu0 %vm828_vm1, %v432_v44 }
 0x1e4   : > { %3026 = vmatmul.msk.f32.gmra.mxu1 %vm828_vm1, %v432_v44  ;;  %v1948_v19 = vpop.xlane.xlu1 %1947  ;;  %v489_v44 = vld [vmem:[%s4855_s2 + $0x188] sm:$0xff] }
 0x1e6   : > { %776 = vperm.xlu0 %3064, %v494_v28  }
 0x1e8   : > { %v3830_v1 = vpop.f32.mrf.mxu0 }
 0x1e9   : > { %701 = vperm.xlu2 %3066, %v479_v61   ;;  %v474_v61 = vld [vmem:[%s4855_s2 + $0x110] sm:$0xff] }
 0x1ea   : > { %v3832_v31 = vpop.f32.mrf.mxu1  ;;  %801 = vperm.xlu1 %3065, %v499_v2  }
 0x1eb   : > { %2962 = vmatmul.msk.f32.gmra.mxu0 %vm828_vm1, %v433_v49 }
 0x1ec   : > { %3027 = vmatmul.msk.f32.gmra.mxu1 %vm828_vm1, %v433_v49  ;;  %v1950_v21 = vpop.xlane.xlu2 %1949  ;;  %v438_v49 = vld [vmem:[%s4854_s1 + $0x1f8] sm:$0xff] }
 0x1ee   : > { %681 = vperm.xlu0 %3064, %v475_v7  }
 0x1f0   : > { %v3850_v6 = vpop.f32.mrf.mxu0 }
 0x1f1   : > { %781 = vperm.xlu2 %3066, %v495_v35  }
 0x1f2   : > { %v3852_v54 = vpop.f32.mrf.mxu1  ;;  %706 = vperm.xlu1 %3065, %v480_v34  }
 0x1f3   : > { %2963 = vmatmul.msk.f32.gmra.mxu0 %vm828_vm1, %v434_v58 }
 0x1f4   : > { %3028 = vmatmul.msk.f32.gmra.mxu1 %vm828_vm1, %v434_v58  ;;  %v1952_v8 = vpop.xlane.xlu0 %1951 }
 0x1f5   : > { %v2051_v34 = vmul.f32 0.00390625, %v1952_v8  ;;  %v2048_v8 = vmul.f32 0.00390625, %v3845_v53  ;;  %v488_v53 = vld [vmem:[%s4855_s2 + $0x180] sm:$0xff] }
 0x1f6   : > { %761 = vperm.xlu0 %3064, %v491_v63  }
 0x1f8   : > { %v3872_v26 = vpop.f32.mrf.mxu0 }
 0x1f9   : > { %686 = vperm.xlu2 %3066, %v476_v17   ;;  %v2050_v17 = vmul.f32 0.00390625, %v1950_v21 }
 0x1fa   : > { %v3874_v0 = vpop.f32.mrf.mxu1  ;;  %786 = vperm.xlu1 %3065, %v496_v18  }
 0x1fb   : > { %2964 = vmatmul.msk.f32.gmra.mxu0 %vm828_vm1, %v435_v62 }
 0x1fc   : > { %3029 = vmatmul.msk.f32.gmra.mxu1 %vm828_vm1, %v435_v62  ;;  %v1954_v12 = vpop.xlane.xlu1 %1953  ;;  %v1902_v29 = vpop.xlane.xlu0 %1901  ;;  %v2049_v62 = vmul.f32 0.00390625, %v1948_v19  ;;  %v2047_v19 = vmul.f32 0.00390625, %v3859_v14 }
 0x1fd   : > { %v2052_v2 = vmul.f32 0.00390625, %v1954_v12 }
 0x1fe   : > { %666 = vperm.xlu0 %3064, %v472_v20   ;;  %v2026_v20 = vmul.f32 0.00390625, %v1902_v29 }
 0x200   : > { %v3890_v10 = vpop.f32.mrf.mxu0 }
 0x201   : > { %766 = vperm.xlu2 %3066, %v492_v22   ;;  %v490_v22 = vld [vmem:[%s4855_s2 + $0x190] sm:$0xff] }
 0x202   : > { %v3892_v47 = vpop.f32.mrf.mxu1  ;;  %691 = vperm.xlu1 %3065, %v477_v52  }
 0x203   : > { %2965 = vmatmul.msk.f32.gmra.mxu0 %vm828_vm1, %v436_v15 }
 0x204   : > { %v1956_v37 = vpop.xlane.xlu2 %1955  ;;  %3030 = vmatmul.msk.f32.gmra.mxu1 %vm828_vm1, %v436_v15 }
 0x205   : > { %v1934_v33 = vpop.xlane.xlu0 %1933  ;;  %v2053_v28 = vmul.f32 0.00390625, %v1956_v37 }
 0x208   : > { %v3905_v13 = vpop.f32.mrf.mxu0 }
 0x209   : > { %671 = vperm.xlu2 %3066, %v473_v27   ;;  %v2046_v27 = vmul.f32 0.00390625, %v3854_v56 }
 0x20a   : > { %v3907_v50 = vpop.f32.mrf.mxu1  ;;  %771 = vperm.xlu1 %3065, %v493_v60   ;;  %v2045_v60 = vmul.f32 0.00390625, %v3825_v48 }
 0x20b   : > { %2966 = vmatmul.msk.f32.gmra.mxu0 %vm828_vm1, %v437_v40 }
 0x20c   : > { %v1958_v24 = vpop.xlane.xlu1 %1957  ;;  %v1938_v45 = vpop.xlane.xlu2 %1937  ;;  %3031 = vmatmul.msk.f32.gmra.mxu1 %vm828_vm1, %v437_v40 }
 0x20d   : > { %v2054_v42 = vmul.f32 0.00390625, %v1958_v24  ;;  %v1896_v52 = vpop.xlane.xlu0 %1895  ;;  %v2044_v24 = vmul.f32 0.00390625, %v1938_v45 }
 0x20e   : > { %v2023_v45 = vmul.f32 0.00390625, %v1896_v52 }
 0x20f   : > { %2360 = vmatpush.msra.mxu3 %v2054_v42 }
 0x210   : > { %v1184_v7 = vpop.f32.mrf.mxu0 }
 0x211   : > { %2361 = vmatpush.msra.mxu3 %v2053_v28  ;;  %751 = vperm.xlu2 %3066, %v489_v44  }
 0x212   : > { %v1393_v35 = vpop.f32.mrf.mxu1  ;;  %676 = vperm.xlu1 %3065, %v474_v61  }
 0x213   : > { %2362 = vmatpush.msra.mxu3 %v2052_v2  ;;  %2967 = vmatmul.msk.f32.gmra.mxu0 %vm828_vm1, %v438_v49 }
 0x214   : > { %v1904_v58 = vpop.xlane.xlu1 %1903  ;;  %v1900_v63 = vpop.xlane.xlu2 %1899  ;;  %3032 = vmatmul.msk.f32.gmra.mxu1 %vm828_vm1, %v438_v49 }
 0x215   : > { %v2027_v18 = vmul.f32 0.00390625, %v1904_v58  ;;  %2363 = vmatpush.msra.mxu3 %v2051_v34  ;;  %v2025_v15 = vmul.f32 0.00390625, %v1900_v63  ;;  %v2042_v34 = vmul.f32 0.00390625, %v1934_v33 }
 0x217   : > { %2258 = vmatpush.msra.mxu2 %v2027_v18  ;;  %2364 = vmatpush.msra.mxu3 %v2050_v17 }
 0x218   : > { %v3926_v12 = vpop.f32.mrf.mxu0 }
 0x219   : > { %2259 = vmatpush.msra.mxu2 %v2026_v20  ;;  %2365 = vmatpush.msra.mxu3 %v2049_v62  ;;  %4861 = vst [vmem:[#allocation3_spill] sm:$0xff] %v3926_v12 }
 0x21a   : > { %v3928_v21 = vpop.f32.mrf.mxu1  ;;  %756 = vperm.xlu1 %3065, %v490_v22  }
 0x21b   : > { %4862 = vst [vmem:[#allocation4_spill] sm:$0xff] %v3928_v21  ;;  %2260 = vmatpush.msra.mxu2 %v2025_v15  ;;  %2366 = vmatpush.msra.mxu3 %v2048_v8 }
 0x21c   : > { %v1936_v29 = vpop.xlane.xlu1 %1935  ;;  %v1932_v37 = vpop.xlane.xlu2 %1931 }
 0x21d   : > { %2367 = vmatpush.msra.mxu3 %v2047_v19  ;;  %v2043_v61 = vmul.f32 0.00390625, %v1936_v29 }
 0x21f   : > { %2368 = vmatpush.msra.mxu3 %v2046_v27 }
 0x220   : > { %v742_v40 = vpop.permute.xlu0 %741  ;;  %v3936_v14 = vpop.f32.mrf.mxu0 }
 0x221   : > { %v1185_v42 = vadd.f32 %v1184_v7, %v742_v40  ;;  %v1394_v44 = vadd.f32 %v1393_v35, %v742_v40  ;;  %2369 = vmatpush.msra.mxu3 %v2045_v60  ;;  %v2041_v7 = vmul.f32 0.00390625, %v1932_v37  ;;  %v2087_v35 = vld [vmem:[%s4856_s3] sm:$0xff] }
 0x222   : > { %v3938_v28 = vpop.f32.mrf.mxu1  ;;  %746 = vperm.xlu1 %3065, %v488_v53  }
 0x223   : > { %v1538_v56 = vmax.f32 %v1185_v42, 0.0  ;;  %v1539_v2 = vmax.f32 %v1394_v44, 0.0  ;;  %2370 = vmatpush.msra.mxu3 %v2044_v24 }
 0x224   : > { %v1928_v48 = vpop.xlane.xlu2 %1927  ;;  %v1898_v49 = vpop.xlane.xlu1 %1897 }
 0x225   : > { %v2024_v58 = vmul.f32 0.00390625, %v1898_v49  ;;  %2371 = vmatpush.msra.mxu3 %v2043_v61  ;;  %v3940_v63 = vadd.f32 %v1539_v2, %v1538_v56  ;;  %v2039_v37 = vmul.f32 0.00390625, %v1928_v48  ;;  %v2095_v2 = vld [vmem:[%s4856_s3 + $0x40] sm:$0xff] }
 0x227   : > { %2261 = vmatpush.msra.mxu2 %v2024_v58  ;;  %2372 = vmatpush.msra.mxu3 %v2042_v34  ;;  %v2099_v58 = vld [vmem:[%s4856_s3 + $0x60] sm:$0xff] }
 0x228   : > { %v732_v17 = vpop.permute.xlu0 %731  ;;  %v3947_v33 = vpop.f32.mrf.mxu0 }
 0x229   : > { %v1179_v18 = vadd.f32 %v3890_v10, %v732_v17  ;;  %v1388_v62 = vadd.f32 %v3892_v47, %v732_v17  ;;  %2262 = vmatpush.msra.mxu2 %v2023_v45  ;;  %2373 = vmatpush.msra.mxu3 %v2041_v7  ;;  %v2091_v10 = vld [vmem:[%s4856_s3 + $0x20] sm:$0xff]  ;;  %v2088_v47 = vld [vmem:[%s4856_s3 + $0x8] sm:$0xff] }
 0x22a   : > { %v3949_v20 = vpop.f32.mrf.mxu1  ;;  %2263 = vmatmul.f32.vlgmr.msra.gmra.mxu2 %v2087_v35  ;;  %v2096_v45 = vld [vmem:[%s4856_s3 + $0x48] sm:$0xff] }
 0x22b   : > { %v1534_v22 = vmax.f32 %v1179_v18, 0.0  ;;  %v1535_v52 = vmax.f32 %v1388_v62, 0.0 }
 0x22c   : > { %v3951_v8 = vpop.permute.xlu2 %821  ;;  %v1930_v15 = vpop.xlane.xlu1 %1929 }
 0x22d   : > { %v2040_v19 = vmul.f32 0.00390625, %v1930_v15  ;;  %v3953_v29 = vadd.f32 %v1535_v52, %v1534_v22 }
 0x22f   : > { %2374 = vmatpush.msra.mxu3 %v2040_v19 }
 0x230   : > { %v727_v27 = vpop.permute.xlu0 %726  ;;  %v3963_v40 = vpop.f32.mrf.mxu0 }
 0x231   : > { %v1176_v60 = vadd.f32 %v3872_v26, %v727_v27  ;;  %v1385_v53 = vadd.f32 %v3874_v0, %v727_v27  ;;  %2375 = vmatpush.msra.mxu3 %v2039_v37  ;;  %v2092_v26 = vld [vmem:[%s4856_s3 + $0x28] sm:$0xff]  ;;  %v2103_v37 = vld [vmem:[%s4856_s3 + $0x80] sm:$0xff] }
 0x232   : > { %v3965_v24 = vpop.f32.mrf.mxu1  ;;  %2266 = vmatmul.f32.gmra.mxu2 %v2091_v10  ;;  %2376 = vmatmul.f32.vlgmr.msra.gmra.mxu3 %v2088_v47  ;;  %v2100_v10 = vld [vmem:[%s4856_s3 + $0x68] sm:$0xff] }
 0x233   : > { %v1532_v42 = vmax.f32 %v1176_v60, 0.0  ;;  %v1533_v44 = vmax.f32 %v1385_v53, 0.0 }
 0x234   : > { %v3967_v61 = vpop.permute.xlu2 %811 }
 0x235   : > { %v3969_v56 = vadd.f32 %v1533_v44, %v1532_v42 }
 0x238   : > { %v3977_v0 = vpop.permute.xlu0 %806  ;;  %v3979_v48 = vpop.f32.mrf.mxu0 }
 0x23a   : > { %v3981_v49 = vpop.f32.mrf.mxu1  ;;  %2269 = vmatmul.f32.gmra.mxu2 %v2095_v2  ;;  %2379 = vmatmul.f32.gmra.mxu3 %v2092_v26 }
 0x23c   : > { %v717_v34 = vpop.permute.xlu2 %716 }
 0x240   : > { %v712_v7 = vpop.permute.xlu0 %711  ;;  %v3989_v35 = vpop.f32.mrf.mxu0 }
 0x241   : > { %v1167_v12 = vadd.f32 %v3810_v46, %v712_v7 }
 0x242   : > { %v3991_v17 = vpop.f32.mrf.mxu1  ;;  %2272 = vmatmul.f32.gmra.mxu2 %v2099_v58  ;;  %2382 = vmatmul.f32.gmra.mxu3 %v2096_v45  ;;  %v2107_v58 = vld [vmem:[%s4856_s3 + $0xa0] sm:$0xff]  ;;  %v2104_v45 = vld [vmem:[%s4856_s3 + $0x88] sm:$0xff] }
 0x244   : > { %v3993_v18 = vpop.permute.xlu2 %796  ;;  %v737_v62 = vpop.permute.xlu1 %736 }
 0x245   : > { %v1182_v22 = vadd.f32 %v3905_v13, %v737_v62  ;;  %v1391_v52 = vadd.f32 %v3907_v50, %v737_v62  ;;  %v1170_v62 = vadd.f32 %v3830_v1, %v717_v34 }
 0x247   : > { %v1536_v15 = vmax.f32 %v1182_v22, 0.0  ;;  %v1537_v19 = vmax.f32 %v1391_v52, 0.0  ;;  %v1379_v52 = vadd.f32 %v3832_v31, %v717_v34  ;;  %v1528_v21 = vmax.f32 %v1170_v62, 0.0  ;;  %v2108_v34 = vld [vmem:[%s4856_s3 + $0xa8] sm:$0xff] }
 0x248   : > { %v4003_v47 = vpop.permute.xlu0 %791  ;;  %v1205_v60 = vpop.f32.mrf.mxu0  ;;  %v1376_v31 = vadd.f32 %v3812_v9, %v712_v7  ;;  %v1526_v62 = vmax.f32 %v1167_v12, 0.0  ;;  %v2115_v12 = vld [vmem:[%s4856_s3 + $0xe0] sm:$0xff] }
 0x249   : > { %v4005_v27 = vadd.f32 %v1537_v19, %v1536_v15  ;;  %v1529_v1 = vmax.f32 %v1379_v52, 0.0 }
 0x24a   : > { %v1414_v53 = vpop.f32.mrf.mxu1  ;;  %2275 = vmatmul.f32.gmra.mxu2 %v2103_v37  ;;  %2385 = vmatmul.f32.gmra.mxu3 %v2100_v10 }
 0x24c   : > { %v702_v13 = vpop.permute.xlu2 %701  ;;  %v4007_v50 = vpop.permute.xlu1 %816 }
 0x24d   : > { %v1161_v42 = vadd.f32 %v3774_v38, %v702_v13  ;;  %v1370_v44 = vadd.f32 %v3776_v39, %v702_v13 }
 0x24f   : > { %v1522_v2 = vmax.f32 %v1161_v42, 0.0  ;;  %v1523_v26 = vmax.f32 %v1370_v44, 0.0 }
 0x250   : > { %v697_v22 = vpop.permute.xlu0 %696  ;;  %v1208_v19 = vpop.f32.mrf.mxu0 }
 0x251   : > { %v1158_v15 = vadd.f32 %v3756_v36, %v697_v22  ;;  %v1367_v38 = vadd.f32 %v3758_v23, %v697_v22  ;;  %v1611_v39 = vadd.f32 %v1523_v26, %v1522_v2  ;;  %v2111_v23 = vld [vmem:[%s4856_s3 + $0xc0] sm:$0xff]  ;;  %v1527_v22 = vmax.f32 %v1376_v31, 0.0 }
 0x252   : > { %v1417_v37 = vpop.f32.mrf.mxu1  ;;  %2278 = vmatmul.f32.gmra.mxu2 %v2107_v58  ;;  %2388 = vmatmul.f32.gmra.mxu3 %v2104_v45  ;;  %v1614_v45 = vadd.f32 %v1529_v1, %v1528_v21  ;;  %v2112_v21 = vld [vmem:[%s4856_s3 + $0xc8] sm:$0xff] }
 0x253   : > { %v1520_v10 = vmax.f32 %v1158_v15, 0.0  ;;  %v1521_v13 = vmax.f32 %v1367_v38, 0.0  ;;  %1973 = vadd.xlane.f32.xlu0 %v1611_v39 }
 0x254   : > { %v782_v42 = vpop.permute.xlu2 %781  ;;  %v4021_v44 = vpop.permute.xlu1 %721 }
 0x255   : > { %v1610_v36 = vadd.f32 %v1521_v13, %v1520_v10 }
 0x257   : > { %1971 = vadd.xlane.f32.xlu1 %v1610_v36 }
 0x258   : > { %v777_v2 = vpop.permute.xlu0 %776  ;;  %v4031_v52 = vpop.f32.mrf.mxu0 }
 0x259   : > { %v1206_v26 = vadd.f32 %v1205_v60, %v777_v2  ;;  %v1415_v58 = vadd.f32 %v1414_v53, %v777_v2  ;;  %v1613_v60 = vadd.f32 %v1527_v22, %v1526_v62  ;;  %v1209_v62 = vadd.f32 %v1208_v19, %v782_v42 }
 0x25a   : > { %v4033_v46 = vpop.f32.mrf.mxu1  ;;  %2281 = vmatmul.f32.gmra.mxu2 %v2111_v23  ;;  %2391 = vmatmul.f32.gmra.mxu3 %v2108_v34  ;;  %v1418_v22 = vadd.f32 %v1417_v37, %v782_v42 }
 0x25b   : > { %v1552_v9 = vmax.f32 %v1206_v26, 0.0  ;;  %v1553_v7 = vmax.f32 %v1415_v58, 0.0  ;;  %1979 = vadd.xlane.f32.xlu0 %v1614_v45  ;;  %v2119_v45 = vld [vmem:[%s4856_s3 + $0x100] sm:$0xff] }
 0x25c   : > { %v4035_v15 = vpop.permute.xlu2 %686  ;;  %v4037_v38 = vpop.permute.xlu1 %801  ;;  %v1555_v37 = vmax.f32 %v1418_v22, 0.0 }
 0x25d   : > { %v4039_v39 = vadd.f32 %v1553_v7, %v1552_v9 }
 0x25f   : > { %1977 = vadd.xlane.f32.xlu1 %v1613_v60 }
 0x260   : > { %v4047_v53 = vpop.permute.xlu0 %681  ;;  %v1214_v10 = vpop.f32.mrf.mxu0 }
 0x261   : > { %v1215_v34 = vadd.f32 %v1214_v10, %v4003_v47 }
 0x262   : > { %v1423_v13 = vpop.f32.mrf.mxu1  ;;  %2284 = vmatmul.f32.gmra.mxu2 %v2115_v12  ;;  %2394 = vmatmul.f32.gmra.mxu3 %v2112_v21 }
 0x263   : > { %1985 = vadd.xlane.f32.xlu0 %v3953_v29  ;;  %v1424_v2 = vadd.f32 %v1423_v13, %v4003_v47  ;;  %v2116_v29 = vld [vmem:[%s4856_s3 + $0xe8] sm:$0xff]  ;;  %v1558_v7 = vmax.f32 %v1215_v34, 0.0 }
 0x264   : > { %v767_v1 = vpop.permute.xlu2 %766  ;;  %v707_v31 = vpop.permute.xlu1 %706 }
 0x265   : > { %v1200_v36 = vadd.f32 %v3979_v48, %v767_v1  ;;  %v1409_v23 = vadd.f32 %v3981_v49, %v767_v1  ;;  %v1559_v60 = vmax.f32 %v1424_v2, 0.0  ;;  %v2120_v1 = vld [vmem:[%s4856_s3 + $0x108] sm:$0xff] }
 0x267   : > { %v1548_v26 = vmax.f32 %v1200_v36, 0.0  ;;  %v1549_v58 = vmax.f32 %v1409_v23, 0.0  ;;  %1983 = vadd.xlane.f32.xlu1 %v3969_v56  ;;  %v1554_v56 = vmax.f32 %v1209_v62, 0.0  ;;  %v1629_v42 = vadd.f32 %v1559_v60, %v1558_v7 }
 0x268   : > { %v762_v48 = vpop.permute.xlu0 %761  ;;  %v1217_v12 = vpop.f32.mrf.mxu0  ;;  %v1164_v7 = vadd.f32 %v3792_v25, %v707_v31  ;;  %v1373_v60 = vadd.f32 %v3794_v57, %v707_v31 }
 0x269   : > { %v1197_v49 = vadd.f32 %v3963_v40, %v762_v48  ;;  %v1406_v9 = vadd.f32 %v3965_v24, %v762_v48  ;;  %v4063_v47 = vadd.f32 %v1549_v58, %v1548_v26  ;;  %v2123_v24 = vld [vmem:[%s4856_s3 + $0x120] sm:$0xff]  ;;  %v1218_v36 = vadd.f32 %v1217_v12, %v3993_v18 }
 0x26a   : > { %v1426_v21 = vpop.f32.mrf.mxu1  ;;  %2287 = vmatmul.f32.gmra.mxu2 %v2119_v45  ;;  %2397 = vmatmul.f32.gmra.mxu3 %v2116_v29  ;;  %v1627_v23 = vadd.f32 %v1555_v37, %v1554_v56  ;;  %v2127_v48 = vld [vmem:[%s4856_s3 + $0x140] sm:$0xff]  ;;  %v1525_v57 = vmax.f32 %v1373_v60, 0.0 }
 0x26b   : > { %v1546_v10 = vmax.f32 %v1197_v49, 0.0  ;;  %v1547_v13 = vmax.f32 %v1406_v9, 0.0  ;;  %1989 = vadd.xlane.f32.xlu0 %v3940_v63  ;;  %v1427_v63 = vadd.f32 %v1426_v21, %v3993_v18  ;;  %v1560_v58 = vmax.f32 %v1218_v36, 0.0  ;;  %v2124_v18 = vld [vmem:[%s4856_s3 + $0x128] sm:$0xff] }
 0x26c   : > { %v4066_v19 = vpop.permute.xlu1 %786 }
 0x26d   : > { %v4068_v40 = vadd.f32 %v1547_v13, %v1546_v10  ;;  %v1561_v45 = vmax.f32 %v1427_v63, 0.0  ;;  %v2131_v63 = vld [vmem:[%s4856_s3 + $0x160] sm:$0xff] }
 0x26f   : > { %2009 = vadd.xlane.f32.xlu1 %v1629_v42  ;;  %v1630_v9 = vadd.f32 %v1561_v45, %v1560_v58 }
 0x270   : > { %v4078_v34 = vpop.f32.mrf.mxu0 }
 0x272   : > { %v4080_v2 = vpop.f32.mrf.mxu1  ;;  %2290 = vmatmul.f32.gmra.mxu2 %v2123_v24  ;;  %2400 = vmatmul.f32.gmra.mxu3 %v2120_v1  ;;  %v1524_v24 = vmax.f32 %v1164_v7, 0.0 }
 0x273   : > { %2005 = vadd.xlane.f32.xlu0 %v1627_v23 }
 0x274   : > { %v692_v26 = vpop.permute.xlu1 %691  ;;  %v1612_v45 = vadd.f32 %v1525_v57, %v1524_v24 }
 0x275   : > { %v1155_v29 = vadd.f32 %v3741_v16, %v692_v26  ;;  %v1364_v62 = vadd.f32 %v3743_v51, %v692_v26 }
 0x277   : > { %v1518_v22 = vmax.f32 %v1155_v29, 0.0  ;;  %v1519_v49 = vmax.f32 %v1364_v62, 0.0 }
 0x278   : > { %v1223_v12 = vpop.f32.mrf.mxu0 }
 0x279   : > { %v1609_v16 = vadd.f32 %v1519_v49, %v1518_v22  ;;  %v1224_v51 = vadd.f32 %v1223_v12, %v3977_v0 }
 0x27a   : > { %v1432_v21 = vpop.f32.mrf.mxu1  ;;  %2293 = vmatmul.f32.gmra.mxu2 %v2127_v48  ;;  %2403 = vmatmul.f32.gmra.mxu3 %v2124_v18 }
 0x27b   : > { %v1433_v10 = vadd.f32 %v1432_v21, %v3977_v0  ;;  %2011 = vadd.xlane.f32.xlu0 %v1630_v9  ;;  %1969 = vadd.xlane.f32.xlu2 %v1609_v16  ;;  %v1564_v56 = vmax.f32 %v1224_v51, 0.0  ;;  %v2128_v0 = vld [vmem:[%s4856_s3 + $0x148] sm:$0xff]  ;;  %v2135_v9 = vld [vmem:[%s4856_s3 + $0x180] sm:$0xff]  ;;  %v672_v51 = vpop.permute.xlu2 %671 }
 0x27c   : > { %v772_v13 = vpop.permute.xlu1 %771 }
 0x27d   : > { %v1565_v37 = vmax.f32 %v1433_v10, 0.0  ;;  %v1203_v42 = vadd.f32 %v3989_v35, %v772_v13  ;;  %v1412_v25 = vadd.f32 %v3991_v17, %v772_v13  ;;  %v1173_v35 = vadd.f32 %v3850_v6, %v4021_v44 }
 0x27e   : > { %v1382_v17 = vadd.f32 %v3852_v54, %v4021_v44  ;;  %v1152_v6 = vadd.f32 %v3729_v41, %v4035_v15  ;;  %v1361_v54 = vadd.f32 %v3731_v43, %v4035_v15  ;;  %v2139_v43 = vld [vmem:[%s4856_s3 + $0x1a0] sm:$0xff]  ;;  %v2136_v15 = vld [vmem:[%s4856_s3 + $0x188] sm:$0xff]  ;;  %v1212_v10 = vadd.f32 %v4031_v52, %v4066_v19 }
 0x27f   : > { %v1550_v31 = vmax.f32 %v1203_v42, 0.0  ;;  %v1551_v1 = vmax.f32 %v1412_v25, 0.0  ;;  %v1632_v36 = vadd.f32 %v1565_v37, %v1564_v56  ;;  %v1530_v22 = vmax.f32 %v1173_v35, 0.0 }
 0x280   : > { %v1226_v26 = vpop.f32.mrf.mxu0  ;;  %v1531_v49 = vmax.f32 %v1382_v17, 0.0  ;;  %v1516_v21 = vmax.f32 %v1152_v6, 0.0  ;;  %v1517_v41 = vmax.f32 %v1361_v54, 0.0  ;;  %v1421_v13 = vadd.f32 %v4033_v46, %v4066_v19  ;;  %v2143_v46 = vld [vmem:[%s4856_s3 + $0x1c0] sm:$0xff]  ;;  %v2140_v19 = vld [vmem:[%s4856_s3 + $0x1a8] sm:$0xff] }
 0x281   : > { %2015 = vadd.xlane.f32.xlu1 %v1632_v36  ;;  %v4102_v23 = vadd.f32 %v1551_v1, %v1550_v31  ;;  %v1227_v29 = vadd.f32 %v1226_v26, %v3967_v61  ;;  %v1556_v31 = vmax.f32 %v1212_v10, 0.0  ;;  %v1143_v36 = vadd.f32 %v3687_v11, %v672_v51 }
 0x282   : > { %v1435_v58 = vpop.f32.mrf.mxu1  ;;  %2296 = vmatmul.f32.gmra.mxu2 %v2131_v63  ;;  %2406 = vmatmul.f32.gmra.mxu3 %v2128_v0  ;;  %v1615_v12 = vadd.f32 %v1531_v49, %v1530_v22  ;;  %v1608_v16 = vadd.f32 %v1517_v41, %v1516_v21  ;;  %v1557_v1 = vmax.f32 %v1421_v13, 0.0  ;;  %v1352_v52 = vadd.f32 %v3689_v5, %v672_v51  ;;  %v2155_v21 = vld [vmem:[%s4856_s3 + $0x220] sm:$0xff]  ;;  %v2152_v41 = vld [vmem:[%s4856_s3 + $0x208] sm:$0xff] }
 0x283   : > { %v1436_v62 = vadd.f32 %v1435_v58, %v3967_v61  ;;  %1975 = vadd.xlane.f32.xlu2 %v1612_v45  ;;  %v1566_v48 = vmax.f32 %v1227_v29, 0.0  ;;  %v2132_v61 = vld [vmem:[%s4856_s3 + $0x168] sm:$0xff]  ;;  %v1430_v11 = vadd.f32 %v4080_v2, %v4037_v38  ;;  %v1510_v5 = vmax.f32 %v1143_v36, 0.0  ;;  %v752_v35 = vpop.permute.xlu2 %751  ;;  %v2147_v2 = vld [vmem:[%s4856_s3 + $0x1e0] sm:$0xff] }
 0x284   : > { %v1511_v0 = vmax.f32 %v1352_v52, 0.0  ;;  %v1149_v17 = vadd.f32 %v3717_v3, %v4047_v53  ;;  %v1400_v45 = vadd.f32 %v3938_v28, %v752_v35  ;;  %v2144_v29 = vld [vmem:[%s4856_s3 + $0x1c8] sm:$0xff]  ;;  %v677_v54 = vpop.permute.xlu1 %676 }
 0x285   : > { %v1567_v18 = vmax.f32 %v1436_v62, 0.0  ;;  %v1563_v58 = vmax.f32 %v1430_v11, 0.0 }
 0x287   : > { %v1633_v44 = vadd.f32 %v1567_v18, %v1566_v48  ;;  %v1543_v48 = vmax.f32 %v1400_v45, 0.0 }
 0x288   : > { %v1229_v7 = vpop.f32.mrf.mxu0 }
 0x289   : > { %2017 = vadd.xlane.f32.xlu0 %v1633_v44  ;;  %v1230_v3 = vadd.f32 %v1229_v7, %v4007_v50 }
 0x28a   : > { %v1438_v60 = vpop.f32.mrf.mxu1  ;;  %2299 = vmatmul.f32.gmra.mxu2 %v2135_v9  ;;  %2409 = vmatmul.f32.gmra.mxu3 %v2132_v61  ;;  %v667_v9 = vpop.permute.xlu0 %666 }
 0x28b   : > { %1981 = vadd.xlane.f32.xlu2 %v1615_v12  ;;  %v1568_v18 = vmax.f32 %v1230_v3, 0.0  ;;  %v1140_v7 = vadd.f32 %v3666_v32, %v667_v9  ;;  %v2215_v12 = vld [vmem:[%s4857_s4] sm:$0xff]  ;;  %v1355_v32 = vadd.f32 %v3702_v59, %v677_v54  ;;  %v2164_v3 = vld [vmem:[%s4856_s3 + $0x268] sm:$0xff] }
 0x28c   : > { %v757_v51 = vpop.permute.xlu1 %756  ;;  %v2159_v59 = vld [vmem:[%s4856_s3 + $0x240] sm:$0xff] }
 0x290   : > { %v1232_v56 = vpop.f32.mrf.mxu0 }
 0x291   : > { %1967 = vadd.xlane.f32.xlu0 %v1608_v16  ;;  %v1233_v42 = vadd.f32 %v1232_v56, %v3951_v8  ;;  %v1146_v16 = vadd.f32 %v3700_v55, %v677_v54  ;;  %v2216_v55 = vld [vmem:[%s4857_s4 + $0x8] sm:$0xff] }
 0x292   : > { %v1441_v37 = vpop.f32.mrf.mxu1  ;;  %2302 = vmatmul.f32.gmra.mxu2 %v2139_v43  ;;  %2412 = vmatmul.f32.gmra.mxu3 %v2136_v15 }
 0x293   : > { %v1442_v25 = vadd.f32 %v1441_v37, %v3951_v8  ;;  %1987 = vadd.xlane.f32.xlu2 %v4005_v27  ;;  %v1570_v24 = vmax.f32 %v1233_v42, 0.0  ;;  %v1221_v8 = vadd.f32 %v4078_v34, %v4037_v38  ;;  %v1628_v27 = vadd.f32 %v1557_v1, %v1556_v31 }
 0x294   : > { %v1191_v34 = vadd.f32 %v3936_v14, %v752_v35  ;;  %v1605_v38 = vadd.f32 %v1511_v0, %v1510_v5  ;;  %v1514_v14 = vmax.f32 %v1149_v17, 0.0  ;;  %v1512_v56 = vmax.f32 %v1146_v16, 0.0  ;;  %v4864_v0 = vld [vmem:[#allocation4_spill] sm:$0xff] }
 0x295   : > { %v1571_v57 = vmax.f32 %v1442_v25, 0.0  ;;  %v1562_v26 = vmax.f32 %v1221_v8, 0.0  ;;  %v1513_v37 = vmax.f32 %v1355_v32, 0.0  ;;  %v2217_v8 = vld [vmem:[%s4857_s4 + $0x10] sm:$0xff] }
 0x296   : > { %v1542_v62 = vmax.f32 %v1191_v34, 0.0 }
 0x297   : > { %v1635_v63 = vadd.f32 %v1571_v57, %v1570_v24  ;;  %v1403_v24 = vadd.f32 %v3949_v20, %v757_v51  ;;  %v1606_v57 = vadd.f32 %v1513_v37, %v1512_v56  ;;  %v2160_v20 = vld [vmem:[%s4856_s3 + $0x248] sm:$0xff] }
 0x298   : > { %v1621_v49 = vadd.f32 %v1543_v48, %v1542_v62 }
 0x299   : > { %1999 = vadd.xlane.f32.xlu0 %v4063_v47  ;;  %2021 = vadd.xlane.f32.xlu1 %v1635_v63  ;;  %v1358_v47 = vadd.f32 %v3719_v4, %v4047_v53  ;;  %v1439_v4 = vadd.f32 %v1438_v60, %v4007_v50  ;;  %v1631_v53 = vadd.f32 %v1563_v58, %v1562_v26  ;;  %v2148_v50 = vld [vmem:[%s4856_s3 + $0x1e8] sm:$0xff]  ;;  %v1545_v36 = vmax.f32 %v1403_v24, 0.0 }
 0x29a   : > { %2305 = vmatmul.f32.gmra.mxu2 %v2143_v46  ;;  %2415 = vmatmul.f32.gmra.mxu3 %v2140_v19  ;;  %v1349_v60 = vadd.f32 %v3668_v30, %v667_v9  ;;  %v1508_v30 = vmax.f32 %v1140_v7, 0.0  ;;  %v747_v19 = vpop.permute.xlu1 %746  ;;  %v2220_v9 = vld [vmem:[%s4857_s4 + $0x28] sm:$0xff] }
 0x29b   : > { %2007 = vadd.xlane.f32.xlu2 %v1628_v27  ;;  %v1515_v28 = vmax.f32 %v1358_v47, 0.0  ;;  %v1569_v22 = vmax.f32 %v1439_v4, 0.0  ;;  %v4863_v27 = vld [vmem:[#allocation3_spill] sm:$0xff]  ;;  %v1397_v35 = vadd.f32 %v4864_v0, %v747_v19 }
 0x29c   : > { %v1509_v15 = vmax.f32 %v1349_v60, 0.0  ;;  %v1188_v5 = vadd.f32 %v4863_v27, %v747_v19  ;;  %v2172_v7 = vld [vmem:[%s4856_s3 + $0x2a8] sm:$0xff] }
 0x29d   : > { %v1607_v6 = vadd.f32 %v1515_v28, %v1514_v14  ;;  %v1634_v44 = vadd.f32 %v1569_v22, %v1568_v18  ;;  %v1541_v34 = vmax.f32 %v1397_v35, 0.0  ;;  %v2219_v18 = vld [vmem:[%s4857_s4 + $0x20] sm:$0xff] }
 0x29e   : > { %v1604_v25 = vadd.f32 %v1509_v15, %v1508_v30  ;;  %v1540_v47 = vmax.f32 %v1188_v5, 0.0  ;;  %v2171_v22 = vld [vmem:[%s4856_s3 + $0x2a0] sm:$0xff]  ;;  %v2221_v30 = vld [vmem:[%s4857_s4 + $0x30] sm:$0xff] }
 0x29f   : > { %v2179_v15 = vld [vmem:[%s4856_s3 + $0x2e0] sm:$0xff] }
 0x2a0   : > { %v1620_v4 = vadd.f32 %v1541_v34, %v1540_v47 }
 0x2a1   : > { %1961 = vadd.xlane.f32.xlu0 %v1605_v38  ;;  %2003 = vadd.xlane.f32.xlu1 %v4039_v39  ;;  %v2151_v39 = vld [vmem:[%s4856_s3 + $0x200] sm:$0xff] }
 0x2a2   : > { %2308 = vmatmul.f32.gmra.mxu2 %v2147_v2  ;;  %2418 = vmatmul.f32.gmra.mxu3 %v2144_v29  ;;  %v2218_v2 = vld [vmem:[%s4857_s4 + $0x18] sm:$0xff]  ;;  %v2167_v29 = vld [vmem:[%s4856_s3 + $0x280] sm:$0xff] }
 0x2a3   : > { %2013 = vadd.xlane.f32.xlu2 %v1631_v53 }
 0x2a9   : > { %1993 = vadd.xlane.f32.xlu0 %v1621_v49  ;;  %1965 = vadd.xlane.f32.xlu1 %v1607_v6  ;;  %v2168_v49 = vld [vmem:[%s4856_s3 + $0x288] sm:$0xff] }
 0x2aa   : > { %2311 = vmatmul.f32.gmra.mxu2 %v2151_v39  ;;  %2421 = vmatmul.f32.gmra.mxu3 %v2148_v50 }
 0x2ab   : > { %2019 = vadd.xlane.f32.xlu2 %v1634_v44 }
 0x2ad   : > { %v2264_v61 = vpop.f32.mrf.mxu2 }
 0x2ae   : > { %v2265_v43 = vadd.f32 %v2264_v61, %v2215_v12  ;;  %v2175_v61 = vld [vmem:[%s4856_s3 + $0x2c0] sm:$0xff] }
 0x2b1   : > { %1997 = vadd.xlane.f32.xlu1 %v4068_v40  ;;  %v2156_v40 = vld [vmem:[%s4856_s3 + $0x228] sm:$0xff] }
 0x2b2   : > { %2314 = vmatmul.f32.gmra.mxu2 %v2155_v21  ;;  %2424 = vmatmul.f32.gmra.mxu3 %v2152_v41 }
 0x2b3   : > { %2001 = vadd.xlane.f32.xlu2 %v4102_v23  ;;  %v1194_v23 = vadd.f32 %v3947_v33, %v757_v51  ;;  %v2163_v33 = vld [vmem:[%s4856_s3 + $0x260] sm:$0xff]  ;;  %v2176_v51 = vld [vmem:[%s4856_s3 + $0x2c8] sm:$0xff] }
 0x2b5   : > { %v2267_v10 = vpop.f32.mrf.mxu2  ;;  %v2377_v13 = vpop.f32.mrf.mxu3  ;;  %v1544_v1 = vmax.f32 %v1194_v23, 0.0 }
 0x2b6   : > { %v4182_v42 = vadd.f32 %v2377_v13, %v2265_v43  ;;  %v2268_v31 = vadd.f32 %v2267_v10, %v2216_v55  ;;  %v2183_v55 = vld [vmem:[%s4856_s3 + $0x300] sm:$0xff] }
 0x2b7   : > { %v1622_v11 = vadd.f32 %v1545_v36, %v1544_v1  ;;  %v2187_v36 = vld [vmem:[%s4856_s3 + $0x320] sm:$0xff] }
 0x2b9   : > { %1959 = vadd.xlane.f32.xlu1 %v1604_v25  ;;  %v2222_v25 = vld [vmem:[%s4857_s4 + $0x38] sm:$0xff] }
 0x2ba   : > { %2317 = vmatmul.f32.gmra.mxu2 %v2159_v59  ;;  %2427 = vmatmul.f32.gmra.mxu3 %v2156_v40  ;;  %v2180_v59 = vld [vmem:[%s4856_s3 + $0x2e8] sm:$0xff] }
 0x2bb   : > { %1963 = vadd.xlane.f32.xlu2 %v1606_v57 }
 0x2bd   : > { %v2270_v52 = vpop.f32.mrf.mxu2  ;;  %v2380_v63 = vpop.f32.mrf.mxu3 }
 0x2be   : > { %v4195_v46 = vadd.f32 %v2380_v63, %v2268_v31  ;;  %v2271_v17 = vadd.f32 %v2270_v52, %v2217_v8  ;;  %v2184_v52 = vld [vmem:[%s4856_s3 + $0x308] sm:$0xff] }
 0x2c2   : > { %2320 = vmatmul.f32.gmra.mxu2 %v2163_v33  ;;  %2430 = vmatmul.f32.gmra.mxu3 %v2160_v20  ;;  %v2191_v20 = vld [vmem:[%s4856_s3 + $0x340] sm:$0xff] }
 0x2c3   : > { %1995 = vadd.xlane.f32.xlu2 %v1622_v11  ;;  %v2188_v11 = vld [vmem:[%s4856_s3 + $0x328] sm:$0xff] }
 0x2c5   : > { %v2273_v26 = vpop.f32.mrf.mxu2  ;;  %v2383_v58 = vpop.f32.mrf.mxu3 }
 0x2c6   : > { %v4208_v45 = vpop.xlane.xlu0 %1973  ;;  %v4210_v38 = vadd.f32 %v2383_v58, %v2271_v17  ;;  %v2274_v53 = vadd.f32 %v2273_v26, %v2218_v2  ;;  %v2195_v26 = vld [vmem:[%s4856_s3 + $0x360] sm:$0xff]  ;;  %v2192_v58 = vld [vmem:[%s4856_s3 + $0x348] sm:$0xff] }
 0x2ca   : > { %2323 = vmatmul.f32.gmra.mxu2 %v2167_v29  ;;  %2433 = vmatmul.f32.gmra.mxu3 %v2164_v3  ;;  %v4247_v41 = vpop.xlane.xlu1 %1971 }
 0x2cb   : > { %1991 = vadd.xlane.f32.xlu2 %v1620_v4  ;;  %v2196_v4 = vld [vmem:[%s4856_s3 + $0x368] sm:$0xff] }
 0x2cd   : > { %v2276_v14 = vpop.f32.mrf.mxu2  ;;  %v2386_v28 = vpop.f32.mrf.mxu3 }
 0x2ce   : > { %v4221_v62 = vpop.xlane.xlu0 %1979  ;;  %v4223_v48 = vadd.f32 %v2386_v28, %v2274_v53  ;;  %v2277_v6 = vadd.f32 %v2276_v14, %v2219_v18  ;;  %v2199_v14 = vld [vmem:[%s4856_s3 + $0x380] sm:$0xff] }
 0x2d2   : > { %2326 = vmatmul.f32.gmra.mxu2 %v2171_v22  ;;  %2436 = vmatmul.f32.gmra.mxu3 %v2168_v49  ;;  %v1978_v40 = vpop.xlane.xlu1 %1977 }
 0x2d5   : > { %v2279_v39 = vpop.f32.mrf.mxu2  ;;  %v2389_v50 = vpop.f32.mrf.mxu3 }
 0x2d6   : > { %v4234_v54 = vpop.xlane.xlu0 %1985  ;;  %v4236_v44 = vadd.f32 %v2389_v50, %v2277_v6  ;;  %v2280_v60 = vadd.f32 %v2279_v39, %v2220_v9 }
 0x2d7   : > { %v2068_v28 = vmul.f32 0.00390625, %v4234_v54  ;;  %v2200_v54 = vld [vmem:[%s4856_s3 + $0x388] sm:$0xff] }
 0x2da   : > { %2329 = vmatmul.f32.gmra.mxu2 %v2175_v61  ;;  %2439 = vmatmul.f32.gmra.mxu3 %v2172_v7  ;;  %v1984_v63 = vpop.xlane.xlu1 %1983  ;;  %v2065_v7 = vmul.f32 0.00390625, %v4221_v62 }
 0x2db   : > { %v2067_v18 = vmul.f32 0.00390625, %v1984_v63 }
 0x2dd   : > { %v2282_v12 = vpop.f32.mrf.mxu2  ;;  %v2392_v21 = vpop.f32.mrf.mxu3 }
 0x2de   : > { %v1990_v16 = vpop.xlane.xlu0 %1989  ;;  %v4249_v32 = vadd.f32 %v2392_v21, %v2280_v60  ;;  %v2283_v10 = vadd.f32 %v2282_v12, %v2221_v30  ;;  %v2203_v60 = vld [vmem:[%s4856_s3 + $0x3a0] sm:$0xff]  ;;  %v2064_v12 = vmul.f32 0.00390625, %v1978_v40 }
 0x2df   : > { %v2070_v43 = vmul.f32 0.00390625, %v1990_v16 }
 0x2e1   : > { %2473 = vmatpush.msrb.mxu2 %v2070_v43 }
 0x2e2   : > { %2332 = vmatmul.f32.gmra.mxu2 %v2179_v15  ;;  %2442 = vmatmul.f32.gmra.mxu3 %v2176_v51  ;;  %v4293_v27 = vpop.xlane.xlu1 %2009  ;;  %v2062_v15 = vmul.f32 0.00390625, %v4208_v45  ;;  %v2204_v51 = vld [vmem:[%s4856_s3 + $0x3a8] sm:$0xff] }
 0x2e5   : > { %v2285_v13 = vpop.f32.mrf.mxu2  ;;  %v2395_v56 = vpop.f32.mrf.mxu3 }
 0x2e6   : > { %v4260_v37 = vadd.f32 %v2395_v56, %v2283_v10  ;;  %v2286_v23 = vadd.f32 %v2285_v13, %v2222_v25  ;;  %v4295_v5 = vpop.xlane.xlu0 %2005  ;;  %v2061_v10 = vmul.f32 0.00390625, %v4247_v41  ;;  %v2207_v56 = vld [vmem:[%s4856_s3 + $0x3c0] sm:$0xff] }
 0x2ea   : > { %2335 = vmatmul.f32.gmra.mxu2 %v2183_v55  ;;  %2445 = vmatmul.f32.gmra.mxu3 %v2180_v59 }
 0x2ed   : > { %v4271_v24 = vpop.f32.mrf.mxu2  ;;  %v2398_v57 = vpop.f32.mrf.mxu3 }
 0x2ee   : > { %v4273_v31 = vadd.f32 %v2398_v57, %v2286_v23  ;;  %v4275_v1 = vpop.xlane.xlu2 %1969  ;;  %v4313_v29 = vpop.xlane.xlu0 %2011 }
 0x2ef   : > { %v2060_v25 = vmul.f32 0.00390625, %v4275_v1  ;;  %v2208_v1 = vld [vmem:[%s4856_s3 + $0x3c8] sm:$0xff] }
 0x2f2   : > { %2338 = vmatmul.f32.gmra.mxu2 %v2187_v36  ;;  %2448 = vmatmul.f32.gmra.mxu3 %v2184_v52  ;;  %v2211_v36 = vld [vmem:[%s4856_s3 + $0x3e0] sm:$0xff] }
 0x2f4   : > { %v4307_v47 = vpop.xlane.xlu1 %2015 }
 0x2f5   : > { %v4283_v19 = vpop.f32.mrf.mxu2  ;;  %v4285_v8 = vpop.f32.mrf.mxu3 }
 0x2f6   : > { %v1976_v33 = vpop.xlane.xlu2 %1975 }
 0x2f7   : > { %v2063_v21 = vmul.f32 0.00390625, %v1976_v33  ;;  %v2083_v33 = vmul.f32 0.00390625, %v4307_v47 }
 0x2fa   : > { %2341 = vmatmul.f32.gmra.mxu2 %v2191_v20  ;;  %2451 = vmatmul.f32.gmra.mxu3 %v2188_v11 }
 0x2fc   : > { %v2018_v50 = vpop.xlane.xlu0 %2017 }
 0x2fd   : > { %v4297_v0 = vpop.f32.mrf.mxu2  ;;  %v4299_v35 = vpop.f32.mrf.mxu3  ;;  %v2084_v52 = vmul.f32 0.00390625, %v2018_v50 }
 0x2fe   : > { %v1982_v17 = vpop.xlane.xlu2 %1981 }
 0x2ff   : > { %v2066_v9 = vmul.f32 0.00390625, %v1982_v17 }
 0x302   : > { %2344 = vmatmul.f32.gmra.mxu2 %v2195_v26  ;;  %2454 = vmatmul.f32.gmra.mxu3 %v2192_v58 }
 0x304   : > { %v1968_v13 = vpop.xlane.xlu0 %1967 }
 0x305   : > { %v4309_v34 = vpop.f32.mrf.mxu2  ;;  %v4311_v2 = vpop.f32.mrf.mxu3  ;;  %v2059_v45 = vmul.f32 0.00390625, %v1968_v13 }
 0x306   : > { %v1988_v3 = vpop.xlane.xlu2 %1987 }
 0x307   : > { %v2069_v53 = vmul.f32 0.00390625, %v1988_v3  ;;  %v2081_v3 = vmul.f32 0.00390625, %v4313_v29 }
 0x309   : > { %2474 = vmatpush.msrb.mxu2 %v2069_v53  ;;  %v2080_v53 = vmul.f32 0.00390625, %v4293_v27 }
 0x30a   : > { %2457 = vmatmul.f32.gmra.mxu3 %v2196_v4  ;;  %2347 = vmatmul.f32.gmra.mxu2 %v2199_v14  ;;  %v2212_v4 = vld [vmem:[%s4856_s3 + $0x3e8] sm:$0xff] }
 0x30b   : > { %2475 = vmatpush.msrb.mxu2 %v2068_v28 }
 0x30c   : > { %v2022_v22 = vpop.xlane.xlu1 %2021  ;;  %v2000_v63 = vpop.xlane.xlu0 %1999 }
 0x30d   : > { %v2086_v49 = vmul.f32 0.00390625, %v2022_v22  ;;  %v4322_v6 = vpop.f32.mrf.mxu2  ;;  %v4324_v39 = vpop.f32.mrf.mxu3  ;;  %2476 = vmatpush.msrb.mxu2 %v2067_v18  ;;  %v2078_v22 = vmul.f32 0.00390625, %v4295_v5  ;;  %v2075_v27 = vmul.f32 0.00390625, %v2000_v63 }
 0x30e   : > { %v2008_v61 = vpop.xlane.xlu2 %2007 }
 0x30f   : > { %2586 = vmatpush.msrb.mxu3 %v2086_v49  ;;  %2477 = vmatpush.msrb.mxu2 %v2066_v9  ;;  %v2079_v47 = vmul.f32 0.00390625, %v2008_v61 }
 0x311   : > { %2478 = vmatpush.msrb.mxu2 %v2065_v7 }
 0x312   : > { %2460 = vmatmul.f32.gmra.mxu3 %v2200_v54  ;;  %2350 = vmatmul.f32.gmra.mxu2 %v2203_v60  ;;  %v2089_v60 = vld [vmem:[%s4856_s3 + $0x10] sm:$0xff] }
 0x313   : > { %2479 = vmatpush.msrb.mxu2 %v2064_v12 }
 0x314   : > { %v2004_v16 = vpop.xlane.xlu1 %2003  ;;  %v1962_v14 = vpop.xlane.xlu0 %1961 }
 0x315   : > { %v4333_v43 = vpop.f32.mrf.mxu2  ;;  %v4335_v30 = vpop.f32.mrf.mxu3  ;;  %2480 = vmatpush.msrb.mxu2 %v2063_v21  ;;  %v2077_v49 = vmul.f32 0.00390625, %v2004_v16  ;;  %v2056_v54 = vmul.f32 0.00390625, %v1962_v14  ;;  %v2106_v14 = vld [vmem:[%s4856_s3 + $0x98] sm:$0xff] }
 0x316   : > { %v2014_v62 = vpop.xlane.xlu2 %2013 }
 0x317   : > { %2481 = vmatpush.msrb.mxu2 %v2062_v15  ;;  %v2082_v17 = vmul.f32 0.00390625, %v2014_v62 }
 0x319   : > { %2482 = vmatpush.msrb.mxu2 %v2061_v10  ;;  %v2093_v10 = vld [vmem:[%s4856_s3 + $0x30] sm:$0xff] }
 0x31a   : > { %2463 = vmatmul.f32.gmra.mxu3 %v2204_v51  ;;  %2353 = vmatmul.f32.gmra.mxu2 %v2207_v56 }
 0x31b   : > { %2483 = vmatpush.msrb.mxu2 %v2060_v25 }
 0x31c   : > { %v1966_v55 = vpop.xlane.xlu1 %1965  ;;  %v1994_v16 = vpop.xlane.xlu0 %1993 }
 0x31d   : > { %v2058_v59 = vmul.f32 0.00390625, %v1966_v55  ;;  %v4346_v40 = vpop.f32.mrf.mxu2  ;;  %v4348_v23 = vpop.f32.mrf.mxu3  ;;  %2484 = vmatpush.msrb.mxu2 %v2059_v45  ;;  %v2072_v51 = vmul.f32 0.00390625, %v1994_v16  ;;  %v2090_v55 = vld [vmem:[%s4856_s3 + $0x18] sm:$0xff] }
 0x31e   : > { %v2020_v41 = vpop.xlane.xlu2 %2019  ;;  %v2118_v16 = vld [vmem:[%s4856_s3 + $0xf8] sm:$0xff] }
 0x31f   : > { %v2085_v57 = vmul.f32 0.00390625, %v2020_v41  ;;  %2485 = vmatpush.msrb.mxu2 %v2058_v59  ;;  %v2097_v59 = vld [vmem:[%s4856_s3 + $0x50] sm:$0xff] }
 0x321   : > { %2587 = vmatpush.msrb.mxu3 %v2085_v57 }
 0x322   : > { %2356 = vmatmul.f32.gmra.mxu2 %v2211_v36  ;;  %2466 = vmatmul.f32.gmra.mxu3 %v2208_v1  ;;  %v2094_v36 = vld [vmem:[%s4856_s3 + $0x38] sm:$0xff]  ;;  %v2101_v1 = vld [vmem:[%s4856_s3 + $0x70] sm:$0xff] }
 0x323   : > { %2588 = vmatpush.msrb.mxu3 %v2084_v52 }
 0x324   : > { %v1998_v26 = vpop.xlane.xlu1 %1997 }
 0x325   : > { %v4357_v20 = vpop.f32.mrf.mxu2  ;;  %v4359_v11 = vpop.f32.mrf.mxu3  ;;  %2589 = vmatpush.msrb.mxu3 %v2083_v33  ;;  %v2074_v21 = vmul.f32 0.00390625, %v1998_v26  ;;  %v2098_v33 = vld [vmem:[%s4856_s3 + $0x58] sm:$0xff] }
 0x326   : > { %v2002_v58 = vpop.xlane.xlu2 %2001 }
 0x327   : > { %2590 = vmatpush.msrb.mxu3 %v2082_v17  ;;  %v2076_v7 = vmul.f32 0.00390625, %v2002_v58  ;;  %v2105_v17 = vld [vmem:[%s4856_s3 + $0x90] sm:$0xff] }
 0x329   : > { %2591 = vmatpush.msrb.mxu3 %v2081_v3  ;;  %v2102_v3 = vld [vmem:[%s4856_s3 + $0x78] sm:$0xff] }
 0x32a   : > { %2469 = vmatmul.f32.gmra.mxu3 %v2212_v4  ;;  %v2109_v4 = vld [vmem:[%s4856_s3 + $0xb0] sm:$0xff] }
 0x32b   : > { %2592 = vmatpush.msrb.mxu3 %v2080_v53 }
 0x32c   : > { %v1960_v9 = vpop.xlane.xlu1 %1959 }
 0x32d   : > { %v4366_v28 = vpop.f32.mrf.mxu2  ;;  %v4368_v18 = vpop.f32.mrf.mxu3  ;;  %2593 = vmatpush.msrb.mxu3 %v2079_v47  ;;  %v2055_v61 = vmul.f32 0.00390625, %v1960_v9  ;;  %v2117_v9 = vld [vmem:[%s4856_s3 + $0xf0] sm:$0xff] }
 0x32e   : > { %v1964_v29 = vpop.xlane.xlu2 %1963 }
 0x32f   : > { %v2057_v50 = vmul.f32 0.00390625, %v1964_v29  ;;  %2594 = vmatpush.msrb.mxu3 %v2078_v22  ;;  %v2113_v22 = vld [vmem:[%s4856_s3 + $0xd0] sm:$0xff] }
 0x331   : > { %2486 = vmatpush.msrb.mxu2 %v2057_v50  ;;  %2595 = vmatpush.msrb.mxu3 %v2077_v49  ;;  %v2110_v50 = vld [vmem:[%s4856_s3 + $0xb8] sm:$0xff] }
 0x333   : > { %2487 = vmatpush.msrb.mxu2 %v2056_v54  ;;  %2596 = vmatpush.msrb.mxu3 %v2076_v7 }
 0x335   : > { %v4374_v12 = vpop.f32.mrf.mxu2  ;;  %v4376_v5 = vpop.f32.mrf.mxu3  ;;  %2488 = vmatpush.msrb.mxu2 %v2055_v61  ;;  %2597 = vmatpush.msrb.mxu3 %v2075_v27  ;;  %v2114_v27 = vld [vmem:[%s4856_s3 + $0xd8] sm:$0xff]  ;;  %v2121_v61 = vld [vmem:[%s4856_s3 + $0x110] sm:$0xff] }
 0x336   : > { %v1996_v15 = vpop.xlane.xlu2 %1995  ;;  %2489 = vmatmul.f32.vlgmr.msrb.gmra.mxu2 %v2089_v60 }
 0x337   : > { %v2073_v62 = vmul.f32 0.00390625, %v1996_v15  ;;  %2598 = vmatpush.msrb.mxu3 %v2074_v21  ;;  %v2125_v15 = vld [vmem:[%s4856_s3 + $0x130] sm:$0xff] }
 0x339   : > { %2599 = vmatpush.msrb.mxu3 %v2073_v62 }
 0x33b   : > { %2600 = vmatpush.msrb.mxu3 %v2072_v51  ;;  %v2122_v51 = vld [vmem:[%s4856_s3 + $0x118] sm:$0xff] }
 0x33d   : > { %v4381_v13 = vpop.f32.mrf.mxu2  ;;  %v4383_v56 = vpop.f32.mrf.mxu3 }
 0x33e   : > { %v1992_v25 = vpop.xlane.xlu2 %1991  ;;  %2492 = vmatmul.f32.gmra.mxu2 %v2093_v10 }
 0x33f   : > { %v2071_v45 = vmul.f32 0.00390625, %v1992_v25  ;;  %v2129_v25 = vld [vmem:[%s4856_s3 + $0x150] sm:$0xff] }
 0x341   : > { %2601 = vmatpush.msrb.mxu3 %v2071_v45  ;;  %v2126_v45 = vld [vmem:[%s4856_s3 + $0x138] sm:$0xff] }
 0x342   : > { %2602 = vmatmul.f32.vlgmr.msrb.gmra.mxu3 %v2090_v55 }
 0x345   : > { %v4391_v41 = vpop.f32.mrf.mxu2  ;;  %v4393_v57 = vpop.f32.mrf.mxu3 }
 0x346   : > { %2495 = vmatmul.f32.gmra.mxu2 %v2097_v59 }
 0x34a   : > { %2605 = vmatmul.f32.gmra.mxu3 %v2094_v36  ;;  %v2133_v36 = vld [vmem:[%s4856_s3 + $0x170] sm:$0xff] }
 0x34d   : > { %v4401_v52 = vpop.f32.mrf.mxu2  ;;  %v4403_v63 = vpop.f32.mrf.mxu3 }
 0x34e   : > { %2498 = vmatmul.f32.gmra.mxu2 %v2101_v1  ;;  %v2130_v1 = vld [vmem:[%s4856_s3 + $0x158] sm:$0xff] }
 0x352   : > { %2608 = vmatmul.f32.gmra.mxu3 %v2098_v33 }
 0x355   : > { %v4411_v26 = vpop.f32.mrf.mxu2  ;;  %v4413_v58 = vpop.f32.mrf.mxu3 }
 0x356   : > { %2501 = vmatmul.f32.gmra.mxu2 %v2105_v17  ;;  %v2137_v17 = vld [vmem:[%s4856_s3 + $0x190] sm:$0xff] }
 0x35a   : > { %2611 = vmatmul.f32.gmra.mxu3 %v2102_v3 }
 0x35d   : > { %v4421_v53 = vpop.f32.mrf.mxu2  ;;  %v4423_v47 = vpop.f32.mrf.mxu3 }
 0x35e   : > { %4865 = vst [vmem:[#allocation3_spill] sm:$0xff] %v4421_v53  ;;  %2504 = vmatmul.f32.gmra.mxu2 %v2109_v4  ;;  %v2134_v4 = vld [vmem:[%s4856_s3 + $0x178] sm:$0xff] }
 0x35f   : > { %4866 = vst [vmem:[#allocation4_spill] sm:$0xff] %v4423_v47 }
 0x362   : > { %2614 = vmatmul.f32.gmra.mxu3 %v2106_v14  ;;  %v2141_v14 = vld [vmem:[%s4856_s3 + $0x1b0] sm:$0xff] }
 0x365   : > { %v4431_v29 = vpop.f32.mrf.mxu2  ;;  %v4433_v49 = vpop.f32.mrf.mxu3 }
 0x366   : > { %4867 = vst [vmem:[#allocation5_spill] sm:$0xff] %v4431_v29  ;;  %2507 = vmatmul.f32.gmra.mxu2 %v2113_v22 }
 0x367   : > { %4868 = vst [vmem:[#allocation6_spill] sm:$0xff] %v4433_v49 }
 0x36a   : > { %2617 = vmatmul.f32.gmra.mxu3 %v2110_v50 }
 0x36d   : > { %v4441_v54 = vpop.f32.mrf.mxu2  ;;  %v4443_v7 = vpop.f32.mrf.mxu3 }
 0x36e   : > { %4869 = vst [vmem:[#allocation7_spill] sm:$0xff] %v4441_v54  ;;  %2510 = vmatmul.f32.gmra.mxu2 %v2117_v9  ;;  %v2138_v9 = vld [vmem:[%s4856_s3 + $0x198] sm:$0xff]  ;;  %v2225_v54 = vld [vmem:[%s4857_s4 + $0x50] sm:$0xff] }
 0x36f   : > { %4870 = vst [vmem:[#allocation8_spill] sm:$0xff] %v4443_v7  ;;  %v2295_v7 = vadd.f32 %v4297_v0, %v2225_v54  ;;  %v2232_v0 = vld [vmem:[%s4857_s4 + $0x88] sm:$0xff] }
 0x372   : > { %2620 = vmatmul.f32.gmra.mxu3 %v2114_v27  ;;  %v2145_v27 = vld [vmem:[%s4856_s3 + $0x1d0] sm:$0xff] }
 0x375   : > { %v4451_v60 = vpop.f32.mrf.mxu2  ;;  %v4453_v21 = vpop.f32.mrf.mxu3 }
 0x376   : > { %4871 = vst [vmem:[#allocation9_spill] sm:$0xff] %v4451_v60  ;;  %2513 = vmatmul.f32.gmra.mxu2 %v2121_v61 }
 0x377   : > { %4872 = vst [vmem:[#allocation10_spill] sm:$0xff] %v4453_v21 }
 0x37a   : > { %2623 = vmatmul.f32.gmra.mxu3 %v2118_v16  ;;  %v2142_v16 = vld [vmem:[%s4856_s3 + $0x1b8] sm:$0xff] }
 0x37d   : > { %v4461_v62 = vpop.f32.mrf.mxu2  ;;  %v4466_v10 = vpop.f32.mrf.mxu3 }
 0x37e   : > { %4873 = vst [vmem:[#allocation11_spill] sm:$0xff] %v4461_v62  ;;  %2516 = vmatmul.f32.gmra.mxu2 %v2125_v15 }
 0x37f   : > { %4874 = vst [vmem:[#allocation12_spill] sm:$0xff] %v4466_v10 }
 0x382   : > { %2626 = vmatmul.f32.gmra.mxu3 %v2122_v51  ;;  %v2149_v51 = vld [vmem:[%s4856_s3 + $0x1f0] sm:$0xff] }
 0x385   : > { %v4474_v55 = vpop.f32.mrf.mxu2  ;;  %v4476_v59 = vpop.f32.mrf.mxu3 }
 0x386   : > { %2519 = vmatmul.f32.gmra.mxu2 %v2129_v25  ;;  %4875 = vst [vmem:[#allocation13_spill] sm:$0xff] %v4474_v55  ;;  %v2228_v55 = vld [vmem:[%s4857_s4 + $0x68] sm:$0xff] }
 0x387   : > { %4876 = vst [vmem:[#allocation14_spill] sm:$0xff] %v4476_v59  ;;  %v2193_v59 = vld [vmem:[%s4856_s3 + $0x350] sm:$0xff] }
 0x38a   : > { %2629 = vmatmul.f32.gmra.mxu3 %v2126_v45  ;;  %v2146_v45 = vld [vmem:[%s4856_s3 + $0x1d8] sm:$0xff] }
 0x38d   : > { %v4484_v33 = vpop.f32.mrf.mxu2  ;;  %v4489_v3 = vpop.f32.mrf.mxu3 }
 0x38e   : > { %2522 = vmatmul.f32.gmra.mxu2 %v2133_v36  ;;  %4877 = vst [vmem:[#allocation15_spill] sm:$0xff] %v4484_v33  ;;  %v2214_v33 = vld [vmem:[%s4856_s3 + $0x3f8] sm:$0xff] }
 0x38f   : > { %4878 = vst [vmem:[#allocation16_spill] sm:$0xff] %v4489_v3 }
 0x392   : > { %2632 = vmatmul.f32.gmra.mxu3 %v2130_v1  ;;  %v2153_v1 = vld [vmem:[%s4856_s3 + $0x210] sm:$0xff] }
 0x395   : > { %v4497_v22 = vpop.f32.mrf.mxu2  ;;  %v4499_v50 = vpop.f32.mrf.mxu3 }
 0x396   : > { %2525 = vmatmul.f32.gmra.mxu2 %v2137_v17  ;;  %4879 = vst [vmem:[#allocation17_spill] sm:$0xff] %v4497_v22  ;;  %v2150_v17 = vld [vmem:[%s4856_s3 + $0x1f8] sm:$0xff]  ;;  %v2304_v22 = vadd.f32 %v4333_v43, %v2228_v55  ;;  %v2231_v43 = vld [vmem:[%s4857_s4 + $0x80] sm:$0xff]  ;;  %v2224_v55 = vld [vmem:[%s4857_s4 + $0x48] sm:$0xff] }
 0x397   : > { %4880 = vst [vmem:[#allocation18_spill] sm:$0xff] %v4499_v50  ;;  %v2292_v49 = vadd.f32 %v4283_v19, %v2224_v55 }
 0x399   : > { %v2405_v19 = vadd.f32 %v4299_v35, %v2292_v49 }
 0x39a   : > { %2635 = vmatmul.f32.gmra.mxu3 %v2134_v4 }
 0x39d   : > { %v4507_v61 = vpop.f32.mrf.mxu2  ;;  %v4512_v15 = vpop.f32.mrf.mxu3 }
 0x39e   : > { %2528 = vmatmul.f32.gmra.mxu2 %v2141_v14  ;;  %4881 = vst [vmem:[#allocation19_spill] sm:$0xff] %v4507_v61 }
 0x39f   : > { %4882 = vst [vmem:[#allocation20_spill] sm:$0xff] %v4512_v15 }
 0x3a2   : > { %2638 = vmatmul.f32.gmra.mxu3 %v2138_v9 }
 0x3a5   : > { %v4517_v25 = vpop.f32.mrf.mxu2  ;;  %v4522_v36 = vpop.f32.mrf.mxu3 }
 0x3a6   : > { %2531 = vmatmul.f32.gmra.mxu2 %v2145_v27  ;;  %4883 = vst [vmem:[#allocation21_spill] sm:$0xff] %v4517_v25  ;;  %v2157_v27 = vld [vmem:[%s4856_s3 + $0x230] sm:$0xff]  ;;  %v2226_v25 = vld [vmem:[%s4857_s4 + $0x58] sm:$0xff] }
 0x3a7   : > { %4884 = vst [vmem:[#allocation22_spill] sm:$0xff] %v4522_v36 }
 0x3aa   : > { %2641 = vmatmul.f32.gmra.mxu3 %v2142_v16  ;;  %v2154_v16 = vld [vmem:[%s4856_s3 + $0x218] sm:$0xff] }
 0x3ad   : > { %v4531_v9 = vpop.f32.mrf.mxu3 }
 0x3ae   : > { %2534 = vmatmul.f32.gmra.mxu2 %v2149_v51  ;;  %4885 = vst [vmem:[#allocation23_spill] sm:$0xff] %v4531_v9 }
 0x3b2   : > { %2644 = vmatmul.f32.gmra.mxu3 %v2146_v45 }
 0x3b6   : > { %2537 = vmatmul.f32.gmra.mxu2 %v2153_v1 }
 0x3b9   : > { %v2490_v4 = vpop.f32.mrf.mxu2 }
 0x3ba   : > { %v2491_v14 = vadd.f32 %v2490_v4, %v4182_v42  ;;  %2647 = vmatmul.f32.gmra.mxu3 %v2150_v17  ;;  %v2161_v42 = vld [vmem:[%s4856_s3 + $0x250] sm:$0xff]  ;;  %v2158_v4 = vld [vmem:[%s4856_s3 + $0x238] sm:$0xff] }
 0x3be   : > { %2540 = vmatmul.f32.gmra.mxu2 %v2157_v27 }
 0x3c1   : > { %v2493_v51 = vpop.f32.mrf.mxu2 }
 0x3c2   : > { %v2494_v45 = vadd.f32 %v2493_v51, %v4195_v46  ;;  %2650 = vmatmul.f32.gmra.mxu3 %v2154_v16  ;;  %v2165_v46 = vld [vmem:[%s4856_s3 + $0x270] sm:$0xff] }
 0x3c5   : > { %v2603_v1 = vpop.f32.mrf.mxu3 }
 0x3c6   : > { %v4543_v17 = vadd.f32 %v2603_v1, %v2491_v14  ;;  %2543 = vmatmul.f32.gmra.mxu2 %v2161_v42  ;;  %v2162_v14 = vld [vmem:[%s4856_s3 + $0x258] sm:$0xff] }
 0x3c9   : > { %v2496_v27 = vpop.f32.mrf.mxu2 }
 0x3ca   : > { %v2497_v10 = vadd.f32 %v2496_v27, %v4210_v38  ;;  %2653 = vmatmul.f32.gmra.mxu3 %v2158_v4  ;;  %v2169_v38 = vld [vmem:[%s4856_s3 + $0x290] sm:$0xff] }
 0x3cd   : > { %v2606_v16 = vpop.f32.mrf.mxu3 }
 0x3ce   : > { %v4552_v51 = vadd.f32 %v2606_v16, %v2494_v45  ;;  %2546 = vmatmul.f32.gmra.mxu2 %v2165_v46  ;;  %v2166_v45 = vld [vmem:[%s4856_s3 + $0x278] sm:$0xff] }
 0x3d1   : > { %v2499_v42 = vpop.f32.mrf.mxu2 }
 0x3d2   : > { %v2500_v1 = vadd.f32 %v2499_v42, %v4223_v48  ;;  %2656 = vmatmul.f32.gmra.mxu3 %v2162_v14  ;;  %v2173_v48 = vld [vmem:[%s4856_s3 + $0x2b0] sm:$0xff] }
 0x3d5   : > { %v2609_v4 = vpop.f32.mrf.mxu3 }
 0x3d6   : > { %v4561_v27 = vadd.f32 %v2609_v4, %v2497_v10  ;;  %2549 = vmatmul.f32.gmra.mxu2 %v2169_v38  ;;  %v2170_v10 = vld [vmem:[%s4856_s3 + $0x298] sm:$0xff] }
 0x3d9   : > { %v2502_v46 = vpop.f32.mrf.mxu2 }
 0x3da   : > { %v2503_v16 = vadd.f32 %v2502_v46, %v4236_v44  ;;  %2659 = vmatmul.f32.gmra.mxu3 %v2166_v45  ;;  %v2177_v44 = vld [vmem:[%s4856_s3 + $0x2d0] sm:$0xff] }
 0x3dd   : > { %v2612_v14 = vpop.f32.mrf.mxu3 }
 0x3de   : > { %v4570_v42 = vadd.f32 %v2612_v14, %v2500_v1  ;;  %2552 = vmatmul.f32.gmra.mxu2 %v2173_v48  ;;  %v2174_v1 = vld [vmem:[%s4856_s3 + $0x2b8] sm:$0xff] }
 0x3e1   : > { %v2505_v38 = vpop.f32.mrf.mxu2 }
 0x3e2   : > { %v2506_v4 = vadd.f32 %v2505_v38, %v4249_v32  ;;  %2662 = vmatmul.f32.gmra.mxu3 %v2170_v10  ;;  %v2181_v32 = vld [vmem:[%s4856_s3 + $0x2f0] sm:$0xff] }
 0x3e5   : > { %v2615_v45 = vpop.f32.mrf.mxu3 }
 0x3e6   : > { %v4579_v46 = vadd.f32 %v2615_v45, %v2503_v16  ;;  %2555 = vmatmul.f32.gmra.mxu2 %v2177_v44  ;;  %v2178_v16 = vld [vmem:[%s4856_s3 + $0x2d8] sm:$0xff] }
 0x3e9   : > { %v2508_v48 = vpop.f32.mrf.mxu2 }
 0x3ea   : > { %v2509_v14 = vadd.f32 %v2508_v48, %v4260_v37  ;;  %2665 = vmatmul.f32.gmra.mxu3 %v2174_v1  ;;  %v2185_v37 = vld [vmem:[%s4856_s3 + $0x310] sm:$0xff] }
 0x3ed   : > { %v2618_v10 = vpop.f32.mrf.mxu3 }
 0x3ee   : > { %v4588_v38 = vadd.f32 %v2618_v10, %v2506_v4  ;;  %2558 = vmatmul.f32.gmra.mxu2 %v2181_v32  ;;  %v2182_v4 = vld [vmem:[%s4856_s3 + $0x2f8] sm:$0xff]  ;;  %v2223_v10 = vld [vmem:[%s4857_s4 + $0x40] sm:$0xff] }
 0x3f1   : > { %v2511_v44 = vpop.f32.mrf.mxu2 }
 0x3f2   : > { %v2512_v45 = vadd.f32 %v2511_v44, %v4273_v31  ;;  %2668 = vmatmul.f32.gmra.mxu3 %v2178_v16  ;;  %v2189_v31 = vld [vmem:[%s4856_s3 + $0x330] sm:$0xff]  ;;  %v2289_v44 = vadd.f32 %v4271_v24, %v2223_v10  ;;  %v2190_v24 = vld [vmem:[%s4856_s3 + $0x338] sm:$0xff] }
 0x3f5   : > { %v2621_v1 = vpop.f32.mrf.mxu3 }
 0x3f6   : > { %v4597_v48 = vadd.f32 %v2621_v1, %v2509_v14  ;;  %2561 = vmatmul.f32.gmra.mxu2 %v2185_v37  ;;  %v2186_v37 = vld [vmem:[%s4856_s3 + $0x318] sm:$0xff] }
 0x3f9   : > { %v2514_v32 = vpop.f32.mrf.mxu2 }
 0x3fa   : > { %2671 = vmatmul.f32.gmra.mxu3 %v2182_v4  ;;  %v2402_v4 = vadd.f32 %v4285_v8, %v2289_v44  ;;  %v2197_v8 = vld [vmem:[%s4856_s3 + $0x370] sm:$0xff] }
 0x3fb   : > { %v2205_v44 = vld [vmem:[%s4856_s3 + $0x3b0] sm:$0xff] }
 0x3fc   : > { %v2515_v3 = vadd.f32 %v2514_v32, %v2402_v4  ;;  %v2202_v4 = vld [vmem:[%s4856_s3 + $0x398] sm:$0xff] }
 0x3fd   : > { %v2624_v16 = vpop.f32.mrf.mxu3 }
 0x3fe   : > { %v4609_v14 = vadd.f32 %v2624_v16, %v2512_v45  ;;  %2564 = vmatmul.f32.gmra.mxu2 %v2189_v31  ;;  %v2198_v31 = vld [vmem:[%s4856_s3 + $0x378] sm:$0xff] }
 0x401   : > { %v4614_v1 = vpop.f32.mrf.mxu2 }
 0x402   : > { %2674 = vmatmul.f32.gmra.mxu3 %v2186_v37 }
 0x405   : > { %v2627_v60 = vpop.f32.mrf.mxu3 }
 0x406   : > { %v4620_v50 = vadd.f32 %v2627_v60, %v2515_v3  ;;  %2567 = vmatmul.f32.gmra.mxu2 %v2193_v59  ;;  %v2194_v60 = vld [vmem:[%s4856_s3 + $0x358] sm:$0xff]  ;;  %v2201_v59 = vld [vmem:[%s4856_s3 + $0x390] sm:$0xff] }
 0x409   : > { %v4625_v45 = vpop.f32.mrf.mxu2 }
 0x40a   : > { %2677 = vmatmul.f32.gmra.mxu3 %v2190_v24 }
 0x40d   : > { %v4630_v10 = vpop.f32.mrf.mxu3 }
 0x40e   : > { %2570 = vmatmul.f32.gmra.mxu2 %v2197_v8  ;;  %v2209_v8 = vld [vmem:[%s4856_s3 + $0x3d0] sm:$0xff] }
 0x411   : > { %v4635_v3 = vpop.f32.mrf.mxu2 }
 0x412   : > { %2680 = vmatmul.f32.gmra.mxu3 %v2194_v60 }
 0x415   : > { %v4640_v32 = vpop.f32.mrf.mxu3 }
 0x416   : > { %2573 = vmatmul.f32.gmra.mxu2 %v2201_v59  ;;  %v2206_v59 = vld [vmem:[%s4856_s3 + $0x3b8] sm:$0xff] }
 0x419   : > { %v2526_v16 = vpop.f32.mrf.mxu2 }
 0x41a   : > { %2683 = vmatmul.f32.gmra.mxu3 %v2198_v31 }
 0x41d   : > { %v2636_v37 = vpop.f32.mrf.mxu3 }
 0x41e   : > { %2576 = vmatmul.f32.gmra.mxu2 %v2205_v44  ;;  %v2213_v44 = vld [vmem:[%s4856_s3 + $0x3f0] sm:$0xff] }
 0x421   : > { %v2529_v24 = vpop.f32.mrf.mxu2 }
 0x422   : > { %2686 = vmatmul.f32.gmra.mxu3 %v2202_v4  ;;  %v2210_v4 = vld [vmem:[%s4856_s3 + $0x3d8] sm:$0xff] }
 0x425   : > { %v2639_v60 = vpop.f32.mrf.mxu3 }
 0x426   : > { %2579 = vmatmul.f32.gmra.mxu2 %v2209_v8  ;;  %v2229_v8 = vld [vmem:[%s4857_s4 + $0x70] sm:$0xff] }
 0x427   : > { %v2307_v36 = vadd.f32 %v4346_v40, %v2229_v8  ;;  %v2417_v8 = vadd.f32 %v4348_v23, %v2304_v22  ;;  %v2408_v23 = vadd.f32 %v4311_v2, %v2295_v7  ;;  %v2316_v2 = vadd.f32 %v4374_v12, %v2232_v0  ;;  %v2233_v12 = vld [vmem:[%s4857_s4 + $0x90] sm:$0xff] }
 0x429   : > { %v2532_v31 = vpop.f32.mrf.mxu2  ;;  %v2420_v40 = vadd.f32 %v4359_v11, %v2307_v36  ;;  %v2530_v36 = vadd.f32 %v2529_v24, %v2417_v8  ;;  %v2707_v24 = vmax.f32 %v4620_v50, 0.0 }
 0x42a   : > { %2689 = vmatmul.f32.gmra.mxu3 %v2206_v59  ;;  %v2230_v59 = vld [vmem:[%s4857_s4 + $0x78] sm:$0xff] }
 0x42d   : > { %v2642_v62 = vpop.f32.mrf.mxu3 }
 0x42e   : > { %2582 = vmatmul.f32.gmra.mxu2 %v2213_v44  ;;  %v2227_v44 = vld [vmem:[%s4857_s4 + $0x60] sm:$0xff] }
 0x42f   : > { %v2301_v61 = vadd.f32 %v4322_v6, %v2227_v44  ;;  %v2298_v6 = vadd.f32 %v4309_v34, %v2226_v25  ;;  %v2643_v34 = vadd.f32 %v2642_v62, %v2530_v36 }
 0x431   : > { %v2535_v15 = vpop.f32.mrf.mxu2  ;;  %v2414_v11 = vadd.f32 %v4335_v30, %v2301_v61  ;;  %v2411_v53 = vadd.f32 %v4324_v39, %v2298_v6  ;;  %v2521_v39 = vadd.f32 %v4625_v45, %v2408_v23  ;;  %v2429_v45 = vadd.f32 %v4383_v56, %v2316_v2 }
 0x432   : > { %2692 = vmatmul.f32.gmra.mxu3 %v2210_v4  ;;  %v2310_v4 = vadd.f32 %v4357_v20, %v2230_v59  ;;  %v2533_v59 = vadd.f32 %v2532_v31, %v2420_v40  ;;  %v2706_v56 = vmax.f32 %v4609_v14, 0.0  ;;  %v2705_v40 = vmax.f32 %v4597_v48, 0.0 }
 0x433   : > { %v2527_v47 = vadd.f32 %v2526_v16, %v2414_v11  ;;  %v2703_v14 = vmax.f32 %v4579_v46, 0.0 }
 0x434   : > { %v2423_v20 = vadd.f32 %v4368_v18, %v2310_v4 }
 0x435   : > { %v2645_v9 = vpop.f32.mrf.mxu3  ;;  %v2640_v54 = vadd.f32 %v2639_v60, %v2527_v47 }
 0x436   : > { %v2536_v44 = vadd.f32 %v2535_v15, %v2423_v20  ;;  %v2646_v4 = vadd.f32 %v2645_v9, %v2533_v59  ;;  %v2518_v9 = vadd.f32 %v4614_v1, %v2405_v19  ;;  %v2234_v20 = vld [vmem:[%s4857_s4 + $0x98] sm:$0xff]  ;;  %v2701_v59 = vmax.f32 %v4561_v27, 0.0 }
 0x437   : > { %v2711_v16 = vmax.f32 %v2640_v54, 0.0  ;;  %v2322_v55 = vadd.f32 %v4391_v41, %v2234_v20  ;;  %v2700_v41 = vmax.f32 %v4552_v51, 0.0 }
 0x438   : > { %v2713_v61 = vmax.f32 %v2646_v4, 0.0  ;;  %v2631_v47 = vadd.f32 %v4630_v10, %v2518_v9  ;;  %v4890_v9 = vld [vmem:[#allocation8_spill] sm:$0xff] }
 0x439   : > { %v2538_v21 = vpop.f32.mrf.mxu2  ;;  %v2435_v8 = vadd.f32 %v4403_v63, %v2322_v55 }
 0x43a   : > { %2695 = vmatmul.f32.gmra.mxu3 %v2214_v33  ;;  %v2313_v33 = vadd.f32 %v4366_v28, %v2231_v43  ;;  %v2524_v28 = vadd.f32 %v4635_v3, %v2411_v53  ;;  %v2708_v1 = vmax.f32 %v2631_v47, 0.0 }
 0x43c   : > { %v2426_v30 = vadd.f32 %v4376_v5, %v2313_v33  ;;  %v2637_v62 = vadd.f32 %v2636_v37, %v2524_v28  ;;  %v2634_v5 = vadd.f32 %v4640_v32, %v2521_v39  ;;  %v2319_v37 = vadd.f32 %v4381_v13, %v2233_v12  ;;  %v2236_v33 = vld [vmem:[%s4857_s4 + $0xa8] sm:$0xff] }
 0x43d   : > { %v2648_v18 = vpop.f32.mrf.mxu3  ;;  %v2704_v13 = vmax.f32 %v4588_v38, 0.0  ;;  %v2235_v38 = vld [vmem:[%s4857_s4 + $0xa0] sm:$0xff]  ;;  %v2328_v51 = vadd.f32 %v4411_v26, %v2236_v33  ;;  %v2238_v26 = vld [vmem:[%s4857_s4 + $0xb8] sm:$0xff] }
 0x43e   : > { %v2649_v29 = vadd.f32 %v2648_v18, %v2536_v44  ;;  %v2539_v15 = vadd.f32 %v2538_v21, %v2426_v30  ;;  %v2710_v35 = vmax.f32 %v2637_v62, 0.0  ;;  %v2709_v21 = vmax.f32 %v2634_v5, 0.0 }
 0x43f   : > { %v2432_v31 = vadd.f32 %v4393_v57, %v2319_v37  ;;  %v2702_v57 = vmax.f32 %v4570_v42, 0.0  ;;  %v2325_v46 = vadd.f32 %v4401_v52, %v2235_v38  ;;  %v2699_v42 = vmax.f32 %v4543_v17, 0.0  ;;  %v2237_v17 = vld [vmem:[%s4857_s4 + $0xb0] sm:$0xff]  ;;  %v4893_v38 = vld [vmem:[#allocation19_spill] sm:$0xff] }
 0x440   : > { %v2714_v25 = vmax.f32 %v2649_v29, 0.0  ;;  %v2712_v29 = vmax.f32 %v2643_v34, 0.0 }
 0x441   : > { %v2541_v22 = vpop.f32.mrf.mxu2  ;;  %v2438_v27 = vadd.f32 %v4413_v58, %v2325_v46  ;;  %v4887_v58 = vld [vmem:[#allocation3_spill] sm:$0xff]  ;;  %v2243_v46 = vld [vmem:[%s4857_s4 + $0xe0] sm:$0xff] }
 0x442   : > { %2737 = vmatpush.msrb.mxu0 %v2714_v25  ;;  %v2542_v3 = vadd.f32 %v2541_v22, %v2429_v45  ;;  %v4886_v25 = vld [vmem:[#allocation4_spill] sm:$0xff]  ;;  %v2331_v30 = vadd.f32 %v4887_v58, %v2237_v17 }
 0x443   : > { %v2441_v23 = vadd.f32 %v4886_v25, %v2328_v51 }
 0x444   : > { %2738 = vmatpush.msrb.mxu0 %v2713_v61  ;;  %v4888_v61 = vld [vmem:[#allocation6_spill] sm:$0xff] }
 0x445   : > { %v2651_v7 = vpop.f32.mrf.mxu3  ;;  %v2444_v19 = vadd.f32 %v4888_v61, %v2331_v30  ;;  %v4900_v30 = vld [vmem:[#allocation20_spill] sm:$0xff] }
 0x446   : > { %v4714_v53 = vadd.f32 %v2651_v7, %v2539_v15  ;;  %2739 = vmatpush.msrb.mxu0 %v2712_v29  ;;  %v4889_v29 = vld [vmem:[#allocation5_spill] sm:$0xff] }
 0x447   : > { %v2334_v15 = vadd.f32 %v4889_v29, %v2238_v26  ;;  %v4901_v26 = vld [vmem:[#allocation11_spill] sm:$0xff]  ;;  %v4902_v29 = vld [vmem:[#allocation18_spill] sm:$0xff] }
 0x448   : > { %2740 = vmatpush.msrb.mxu0 %v2711_v16  ;;  %v2239_v16 = vld [vmem:[%s4857_s4 + $0xc0] sm:$0xff] }
 0x449   : > { %v2544_v49 = vpop.f32.mrf.mxu2  ;;  %v2447_v5 = vadd.f32 %v4890_v9, %v2334_v15 }
 0x44a   : > { %2741 = vmatpush.msrb.mxu0 %v2710_v35  ;;  %v2545_v43 = vadd.f32 %v2544_v49, %v2432_v31  ;;  %v4891_v49 = vld [vmem:[#allocation7_spill] sm:$0xff] }
 0x44b   : > { %v2337_v45 = vadd.f32 %v4891_v49, %v2239_v16  ;;  %v4903_v16 = vld [vmem:[#allocation9_spill] sm:$0xff]  ;;  %v4904_v49 = vld [vmem:[#allocation16_spill] sm:$0xff] }
 0x44c   : > { %2742 = vmatpush.msrb.mxu0 %v2709_v21 }
 0x44d   : > { %v2654_v32 = vpop.f32.mrf.mxu3 }
 0x44e   : > { %v4723_v10 = vadd.f32 %v2654_v32, %v2542_v3  ;;  %2743 = vmatpush.msrb.mxu0 %v2708_v1  ;;  %v4892_v1 = vld [vmem:[#allocation10_spill] sm:$0xff] }
 0x44f   : > { %v2450_v3 = vadd.f32 %v4892_v1, %v2337_v45 }
 0x450   : > { %2744 = vmatpush.msrb.mxu0 %v2707_v24 }
 0x451   : > { %v2547_v60 = vpop.f32.mrf.mxu2 }
 0x452   : > { %2745 = vmatpush.msrb.mxu0 %v2706_v56  ;;  %v2548_v44 = vadd.f32 %v2547_v60, %v2435_v8  ;;  %v2244_v8 = vld [vmem:[%s4857_s4 + $0xe8] sm:$0xff] }
 0x454   : > { %2746 = vmatpush.msrb.mxu0 %v2705_v40 }
 0x455   : > { %v2657_v50 = vpop.f32.mrf.mxu3 }
 0x456   : > { %v4733_v6 = vadd.f32 %v2657_v50, %v2545_v43  ;;  %2747 = vmatpush.msrb.mxu0 %v2704_v13 }
 0x458   : > { %2748 = vmatpush.msrb.mxu0 %v2703_v14 }
 0x459   : > { %v2550_v48 = vpop.f32.mrf.mxu2 }
 0x45a   : > { %2749 = vmatpush.msrb.mxu0 %v2702_v57  ;;  %v2551_v36 = vadd.f32 %v2550_v48, %v2438_v27  ;;  %v2245_v57 = vld [vmem:[%s4857_s4 + $0xf0] sm:$0xff]  ;;  %v2246_v48 = vld [vmem:[%s4857_s4 + $0xf8] sm:$0xff] }
 0x45b   : > { %v2242_v27 = vld [vmem:[%s4857_s4 + $0xd8] sm:$0xff] }
 0x45c   : > { %2750 = vmatpush.msrb.mxu0 %v2701_v59 }
 0x45d   : > { %v2660_v11 = vpop.f32.mrf.mxu3 }
 0x45e   : > { %v4744_v18 = vadd.f32 %v2660_v11, %v2548_v44  ;;  %2751 = vmatpush.msrb.mxu0 %v2700_v41  ;;  %v2355_v44 = vadd.f32 %v4893_v38, %v2245_v57  ;;  %v4894_v41 = vld [vmem:[#allocation21_spill] sm:$0xff] }
 0x45f   : > { %v2358_v11 = vadd.f32 %v4894_v41, %v2246_v48 }
 0x460   : > { %2752 = vmatpush.msrb.mxu0 %v2699_v42  ;;  %v4895_v42 = vld [vmem:[#allocation17_spill] sm:$0xff] }
 0x461   : > { %v2553_v63 = vpop.f32.mrf.mxu2 }
 0x462   : > { %v2554_v22 = vadd.f32 %v2553_v63, %v2441_v23  ;;  %v2352_v63 = vadd.f32 %v4895_v42, %v2244_v8  ;;  %v4898_v23 = vld [vmem:[#allocation23_spill] sm:$0xff] }
 0x463   : > { %v2471_v17 = vadd.f32 %v4898_v23, %v2358_v11  ;;  %v2733_v11 = vld [vmem:[%s4858_s5 + $0x10] sm:$0x3] }
 0x465   : > { %v2663_v4 = vpop.f32.mrf.mxu3 }
 0x466   : > { %v4752_v34 = vadd.f32 %v2663_v4, %v2551_v36  ;;  %v2241_v36 = vld [vmem:[%s4857_s4 + $0xd0] sm:$0xff]  ;;  %v4896_v4 = vld [vmem:[#allocation15_spill] sm:$0xff] }
 0x467   : > { %v2349_v51 = vadd.f32 %v4896_v4, %v2243_v46 }
 0x469   : > { %v2556_v52 = vpop.f32.mrf.mxu2  ;;  %v2462_v15 = vadd.f32 %v4902_v29, %v2349_v51 }
 0x46a   : > { %v2557_v39 = vadd.f32 %v2556_v52, %v2444_v19  ;;  %v4897_v52 = vld [vmem:[#allocation22_spill] sm:$0xff] }
 0x46b   : > { %v2468_v25 = vadd.f32 %v4897_v52, %v2355_v44 }
 0x46d   : > { %v2666_v0 = vpop.f32.mrf.mxu3 }
 0x46e   : > { %v4759_v28 = vadd.f32 %v2666_v0, %v2554_v22  ;;  %v2240_v22 = vld [vmem:[%s4857_s4 + $0xc8] sm:$0xff]  ;;  %v4899_v0 = vld [vmem:[#allocation13_spill] sm:$0xff] }
 0x46f   : > { %v2346_v58 = vadd.f32 %v4899_v0, %v2242_v27 }
 0x471   : > { %v2559_v54 = vpop.f32.mrf.mxu2  ;;  %v2459_v45 = vadd.f32 %v4904_v49, %v2346_v58 }
 0x472   : > { %v2560_v47 = vadd.f32 %v2559_v54, %v2447_v5  ;;  %v2465_v54 = vadd.f32 %v4900_v30, %v2352_v63 }
 0x475   : > { %v2669_v62 = vpop.f32.mrf.mxu3 }
 0x476   : > { %v4766_v2 = vadd.f32 %v2669_v62, %v2557_v39  ;;  %v2343_v39 = vadd.f32 %v4901_v26, %v2241_v36  ;;  %v2736_v36 = vld [vmem:[%s4859_s6 + $0x8] sm:$0x3] }
 0x478   : > { %v2721_v27 = vmax.f32 %v4766_v2, 0.0 }
 0x479   : > { %v2562_v7 = vpop.f32.mrf.mxu2 }
 0x47a   : > { %v2563_v32 = vadd.f32 %v2562_v7, %v2450_v3 }
 0x47d   : > { %v2672_v35 = vpop.f32.mrf.mxu3 }
 0x47e   : > { %v4773_v21 = vadd.f32 %v2672_v35, %v2560_v47  ;;  %v2340_v47 = vadd.f32 %v4903_v16, %v2240_v22  ;;  %v2731_v35 = vld [vmem:[%s4858_s5] sm:$0xff] }
 0x47f   : > { %2753 = vmatmul.f32.vlgmr.msrb.gmra.mxu0 %v2731_v35 }
 0x481   : > { %v2565_v12 = vpop.f32.mrf.mxu2 }
 0x485   : > { %v2675_v37 = vpop.f32.mrf.mxu3 }
 0x486   : > { %v4776_v24 = vadd.f32 %v2675_v37, %v2563_v32  ;;  %v4905_v37 = vld [vmem:[#allocation14_spill] sm:$0xff] }
 0x487   : > { %2756 = vmatmul.f32.gmra.mxu0 %v2733_v11 }
 0x489   : > { %v2568_v56 = vpop.f32.mrf.mxu2 }
 0x48d   : > { %v2678_v60 = vpop.f32.mrf.mxu3 }
 0x491   : > { %v2571_v31 = vpop.f32.mrf.mxu2 }
 0x492   : > { %v2572_v57 = vadd.f32 %v2571_v31, %v2459_v45 }
 0x495   : > { %v2681_v40 = vpop.f32.mrf.mxu3 }
 0x499   : > { %v2574_v20 = vpop.f32.mrf.mxu2 }
 0x49a   : > { %v2575_v1 = vadd.f32 %v2574_v20, %v2462_v15 }
 0x49d   : > { %v2684_v43 = vpop.f32.mrf.mxu3 }
 0x49e   : > { %v2685_v44 = vadd.f32 %v2684_v43, %v2572_v57  ;;  %v2722_v43 = vmax.f32 %v4773_v21, 0.0  ;;  %v2715_v21 = vmax.f32 %v4714_v53, 0.0 }
 0x4a0   : > { %v2726_v63 = vmax.f32 %v2685_v44, 0.0 }
 0x4a1   : > { %v2577_v13 = vpop.f32.mrf.mxu2 }
 0x4a2   : > { %v2578_v7 = vadd.f32 %v2577_v13, %v2465_v54  ;;  %v4906_v13 = vld [vmem:[#allocation12_spill] sm:$0xff] }
 0x4a5   : > { %v2687_v50 = vpop.f32.mrf.mxu3 }
 0x4a6   : > { %v2688_v48 = vadd.f32 %v2687_v50, %v2575_v1 }
 0x4a8   : > { %v2727_v46 = vmax.f32 %v2688_v48, 0.0 }
 0x4a9   : > { %v2580_v14 = vpop.f32.mrf.mxu2 }
 0x4aa   : > { %v2581_v61 = vadd.f32 %v2580_v14, %v2468_v25  ;;  %v2456_v14 = vadd.f32 %v4905_v37, %v2343_v39 }
 0x4ac   : > { %v2569_v38 = vadd.f32 %v2568_v56, %v2456_v14  ;;  %v2723_v56 = vmax.f32 %v4776_v24, 0.0  ;;  %v2716_v24 = vmax.f32 %v4723_v10, 0.0  ;;  %v2735_v10 = vld [vmem:[%s4859_s6] sm:$0xff] }
 0x4ad   : > { %v2690_v55 = vpop.f32.mrf.mxu3 }
 0x4ae   : > { %v2691_v3 = vadd.f32 %v2690_v55, %v2578_v7  ;;  %v2682_v55 = vadd.f32 %v2681_v40, %v2569_v38  ;;  %v2718_v40 = vmax.f32 %v4744_v18, 0.0  ;;  %v2734_v18 = vld [vmem:[%s4858_s5 + $0x18] sm:$0x3] }
 0x4b0   : > { %v2728_v41 = vmax.f32 %v2691_v3, 0.0  ;;  %v2725_v31 = vmax.f32 %v2682_v55, 0.0 }
 0x4b1   : > { %v2583_v33 = vpop.f32.mrf.mxu2 }
 0x4b2   : > { %v2584_v19 = vadd.f32 %v2583_v33, %v2471_v17  ;;  %v2717_v33 = vmax.f32 %v4733_v6, 0.0 }
 0x4b5   : > { %v2693_v59 = vpop.f32.mrf.mxu3 }
 0x4b6   : > { %v2694_v9 = vadd.f32 %v2693_v59, %v2581_v61  ;;  %v2453_v59 = vadd.f32 %v4906_v13, %v2340_v47 }
 0x4b8   : > { %v2729_v8 = vmax.f32 %v2694_v9, 0.0  ;;  %v2566_v20 = vadd.f32 %v2565_v12, %v2453_v59  ;;  %v2720_v12 = vmax.f32 %v4759_v28, 0.0  ;;  %v2732_v28 = vld [vmem:[%s4858_s5 + $0x8] sm:$0xff] }
 0x4ba   : > { %v2679_v42 = vadd.f32 %v2678_v60, %v2566_v20  ;;  %v2719_v60 = vmax.f32 %v4752_v34, 0.0 }
 0x4bc   : > { %v2724_v50 = vmax.f32 %v2679_v42, 0.0 }
 0x4bd   : > { %v2696_v62 = vpop.f32.mrf.mxu3 }
 0x4be   : > { %v2697_v5 = vadd.f32 %v2696_v62, %v2584_v19 }
 0x4c0   : > { %v2730_v32 = vmax.f32 %v2697_v5, 0.0 }
 0x4c2   : > { %2760 = vmatpush.msrb.mxu1 %v2730_v32 }
 0x4c4   : > { %2761 = vmatpush.msrb.mxu1 %v2729_v8 }
 0x4c6   : > { %2762 = vmatpush.msrb.mxu1 %v2728_v41 }
 0x4c8   : > { %2763 = vmatpush.msrb.mxu1 %v2727_v46 }
 0x4ca   : > { %2764 = vmatpush.msrb.mxu1 %v2726_v63 }
 0x4cc   : > { %2765 = vmatpush.msrb.mxu1 %v2725_v31 }
 0x4ce   : > { %2766 = vmatpush.msrb.mxu1 %v2724_v50 }
 0x4d0   : > { %2767 = vmatpush.msrb.mxu1 %v2723_v56 }
 0x4d2   : > { %2768 = vmatpush.msrb.mxu1 %v2722_v43 }
 0x4d4   : > { %2769 = vmatpush.msrb.mxu1 %v2721_v27 }
 0x4d6   : > { %2770 = vmatpush.msrb.mxu1 %v2720_v12 }
 0x4d8   : > { %2771 = vmatpush.msrb.mxu1 %v2719_v60 }
 0x4da   : > { %2772 = vmatpush.msrb.mxu1 %v2718_v40 }
 0x4dc   : > { %2773 = vmatpush.msrb.mxu1 %v2717_v33 }
 0x4de   : > { %2774 = vmatpush.msrb.mxu1 %v2716_v24 }
 0x4e0   : > { %2775 = vmatpush.msrb.mxu1 %v2715_v21 }
 0x4e1   : > { %2776 = vmatmul.f32.vlgmr.msrb.gmra.mxu1 %v2732_v28 }
 0x4e9   : > { %2779 = vmatmul.f32.gmra.mxu1 %v2734_v18 }
 0x4fc   : > { %v2754_v34 = vpop.f32.mrf.mxu0 }
 0x4fd   : > { %v2755_v6 = vadd.f32 %v2754_v34, %v2735_v10 }
 0x504   : > { %v2757_v4 = vpop.f32.mrf.mxu0 }
 0x505   : > { %v2758_v52 = vadd.f32 %v2757_v4, %v2736_v36 }
 0x55e   : > { %v2777_v2 = vpop.f32.mrf.mxu1 }
 0x55f   : > { %v2778_v53 = vadd.f32 %v2777_v2, %v2755_v6 }
 0x561   : > { %v3033_v51 = vmul.f32 -1.442695, %v2778_v53 }
 0x563   : > { %3067 = vpow2.f32 %v3033_v51 }
 0x566   : > { %v2780_v25 = vpop.f32.mrf.mxu1 }
 0x567   : > { %v2781_v23 = vadd.f32 %v2780_v25, %v2758_v52 }
 0x569   : > { %v3068_v17 = vpop.eup %3067  ;;  %v3034_v22 = vmul.f32 -1.442695, %v2781_v23 }
 0x56a   : > { %v2789_v0 = vadd.f32 1.0, %v3068_v17 }
 0x56b   : > { %3069 = vpow2.f32 %v3034_v22 }
 0x56c   : > { %3071 = vrcp.f32 %v2789_v0  ;;  %v2802_v26 = vand.u32 2147483648, %v2789_v0  ;;  %v2800_v62 = vand.u32 2147483647, %v2789_v0  ;;  %vm2796_vm3 = vweird.f32 %v2789_v0 }
 0x56e   : > { %v2803_v7 = vor.u32 1.1754944e-38, %v2802_v26  ;;  %vm2801_vm6 = vcmp.eq.f32.partialorder %v2800_v62, 8.507059e+37 }
 0x571   : > { %v3070_v58 = vpop.eup %3069 }
 0x572   : > { %v3072_v30 = vpop.eup %3071  ;;  %v2790_v54 = vadd.f32 1.0, %v3070_v58 }
 0x573   : > { %v2792_v61 = vmul.f32 %v3072_v30, %v2789_v0  ;;  %vm2797_vm2 = vweird.f32 %v3072_v30 }
 0x574   : > { %3073 = vrcp.f32 %v2790_v54  ;;  %vm2798_vm4 = vmor %vm2796_vm3, %vm2797_vm2  ;;  %v2817_v35 = vand.u32 2147483648, %v2790_v54  ;;  %v2815_v45 = vand.u32 2147483647, %v2790_v54  ;;  %vm2811_vm8 = vweird.f32 %v2790_v54 }
 0x575   : > { %v2793_v19 = vsub.f32 1.0, %v2792_v61 }
 0x576   : > { %v2818_v3 = vor.u32 1.1754944e-38, %v2817_v35  ;;  %vm2816_vm11 = vcmp.eq.f32.partialorder %v2815_v45, 8.507059e+37 }
 0x577   : > { %v2794_v39 = vmul.f32 %v3072_v30, %v2793_v19 }
 0x579   : > { %v2795_v29 = vadd.f32 %v3072_v30, %v2794_v39 }
 0x57a   : > { %v3074_v15 = vpop.eup %3073 }
 0x57b   : > { %v2799_v9 = vsel %vm2798_vm4, %v3072_v30, %v2795_v29  ;;  %v2807_v5 = vmul.f32 %v3074_v15, %v2790_v54  ;;  %vm2812_vm7 = vweird.f32 %v3074_v15 }
 0x57c   : > { %v2804_v16 = vsel %vm2801_vm6, %v2803_v7, %v2799_v9  ;;  %vm2813_vm9 = vmor %vm2811_vm8, %vm2812_vm7 }
 0x57d   : > { %2822 = vst.msk [vmem:[%s306_s11] sm:$0xff] %vm2821_vm5, %v2804_v16  ;;  %v2808_v47 = vsub.f32 1.0, %v2807_v5 }
 0x57f   : > { %v2809_v49 = vmul.f32 %v3074_v15, %v2808_v47 }
 0x581   : > { %v2810_v1 = vadd.f32 %v3074_v15, %v2809_v49 }
 0x583   : > { %v2814_v32 = vsel %vm2813_vm9, %v3074_v15, %v2810_v1 }
 0x584   : > { %v2819_v37 = vsel %vm2816_vm11, %v2818_v3, %v2814_v32 }
 0x585   : > { %2824 = vst.msk [vmem:[%s306_s11 + $0x8] sm:$0x3] %vm2823_vm10, %v2819_v37 }
 0x586 PF: > { %s17_s26 = sadd.s32 1, %s3097_s26   ;;  %s4907_s24 = smov %s3093_s25 }
 0x587   : > { %p14_p5 = scmp.ge.s32.totalorder %s17_s26, 4   ;;  %s4908_s25 = smov %s4910_s27 }
 0x589   :  { %16 = sbr.rel (!%p14_p5) target bundleno = 2 (0x2), region = 86 }

</bundles_post_ra>
